<compile_context>
chip_gen: v5e
topology: v5e:2x2
jax: 0.10.0
libtpu: 0.0.40
codegen_flags: <defaults>
</compile_context>

<pallas_src>
import math
import jax
import jax.numpy as jnp
from jax.experimental import pallas as pl
from jax.experimental.pallas import tpu as pltpu

B, S, H = 2, 8, 32          # batch, seq, hidden
NH = 4                      # num_attention_heads
HD = H // NH                # attention_head_size
I = 64                      # intermediate_size
EPS = 1e-5

R = B * S                   # 16 flattened tokens (rows ordered (b, s))
G = NH * B * S              # 64 (head, batch, query) rows of the batched attention
KPAD = 128                  # key columns padded to a full 128-lane vreg
NEG_BIG = -1e9

# lane offsets inside the (H, 640) weight slab (all 128-aligned)
W_Q, W_K, W_V, W_O, W_I = 0, 128, 256, 384, 512
# row offsets inside the (144, 64) misc slab
ROW_W2, ROW_SEL, ROW_VEC, MISC_ROWS = 0, I, 2 * I, 144


def _layernorm(x, gamma, beta):
    # x: (R, H); gamma/beta: (1, H).  Biased variance (matches torch LayerNorm).
    mean = jnp.mean(x, axis=-1, keepdims=True)
    var = jnp.mean((x - mean) ** 2, axis=-1, keepdims=True)
    return (x - mean) * jax.lax.rsqrt(var + EPS) * gamma + beta


def _gelu(x):
    # exact erf-based gelu, matching the reference `gelu`
    return x * 0.5 * (1.0 + jax.lax.erf(x / math.sqrt(2.0)))


def bert_layer_kernel(x_ref, mask_ref, w_ref, misc_ref, out_ref, probs_ref):
    xpad = x_ref[...]                       # (KPAD, H); rows >= R are zero
    xf = xpad[0:R, :]                       # (R, H) real tokens, rows = (b, s)
    mask = mask_ref[...]                    # (G, KPAD) combined additive mask

    # --- packed parameter slabs; every slice starts on a vreg boundary ---
    wq = w_ref[:, W_Q:W_Q + H]              # already scaled by 1/sqrt(HD)
    wk = w_ref[:, W_K:W_K + H]
    wv = w_ref[:, W_V:W_V + H]
    wo = w_ref[:, W_O:W_O + H]
    wi = w_ref[:, W_I:W_I + I]
    w2 = misc_ref[ROW_W2:ROW_W2 + I, 0:H]   # (I, H)
    sel = misc_ref[ROW_SEL:ROW_SEL + G, 0:H]          # (G, H) head-selector 0/1 mask
    vecs = misc_ref[ROW_VEC:MISC_ROWS, 0:I]           # (16, I) bias/gamma/beta rows
    bq, bk, bv = vecs[0:1, 0:H], vecs[1:2, 0:H], vecs[2:3, 0:H]
    bo, g1, be1 = vecs[3:4, 0:H], vecs[4:5, 0:H], vecs[5:6, 0:H]
    bi = vecs[6:7, 0:I]
    b2, g2, be2 = vecs[7:8, 0:H], vecs[8:9, 0:H], vecs[9:10, 0:H]

    # --- projections (query scale folded into wq/bq at pack time) ---
    q = jnp.dot(xf, wq, preferred_element_type=jnp.float32) + bq      # (R, H)
    k = jnp.dot(xpad, wk, preferred_element_type=jnp.float32) + bk    # (KPAD, H)
    v = jnp.dot(xpad, wv, preferred_element_type=jnp.float32) + bv    # (KPAD, H)

    # --- all heads & batches at once; scores/probs are lane-dense (G, 128) ---
    # Row g = h*R + b*S + i; column c = b'*S + j for c < R, padding otherwise.
    # Head selection is done by zeroing the other heads' feature columns of the
    # replicated query, so one dense 2-D matmul contracts only head h's features.
    sel3 = sel.reshape(NH, R, H)                                      # (NH, R, H)
    qhat = (q[None, :, :] * sel3).reshape(G, H)                       # (G, H)
    scores = jnp.einsum('gd,kd->gk', qhat, k,
                        preferred_element_type=jnp.float32)           # (G, KPAD)
    scores = scores + mask                                            # one add

    s_max = jnp.max(scores, axis=-1, keepdims=True)
    e = jnp.exp(scores - s_max)
    probs = e / jnp.sum(e, axis=-1, keepdims=True)                    # (G, KPAD)
    # hard-zero cross-batch / padded key columns (robust even if NEG_BIG changes)
    probs = jnp.where(mask > 0.5 * NEG_BIG, probs, 0.0)
    # TODO(synk): attention-probs / hidden dropout omitted (identity at inference).
    probs_ref[...] = probs                        # single unmasked lane-dense store

    # context: padded / cross-batch prob entries are exactly zero, so one matmul
    # over all 128 key rows is exact; keep the matching head's columns and merge.
    ctx_all = jnp.dot(probs, v, preferred_element_type=jnp.float32)   # (G, H)
    ctx = jnp.sum(ctx_all.reshape(NH, R, H) * sel3, axis=0)           # (R, H)

    # --- BertSelfOutput: dense + residual + LayerNorm ---
    attn = jnp.dot(ctx, wo, preferred_element_type=jnp.float32) + bo
    attn = _layernorm(attn + xf, g1, be1)

    # --- BertIntermediate: dense + gelu ---
    inter = _gelu(jnp.dot(attn, wi, preferred_element_type=jnp.float32) + bi)

    # --- BertOutput: dense + residual + LayerNorm ---
    out = jnp.dot(inter, w2, preferred_element_type=jnp.float32) + b2
    out_ref[...] = _layernorm(out + attn, g2, be2)


def pack_params(p):
    """One-time packing into two slabs (one weight slab, one misc slab)."""
    scale = 1.0 / math.sqrt(HD)

    wslab = jnp.zeros((H, 640), jnp.float32)
    wslab = wslab.at[:, W_Q:W_Q + H].set(p["wq"] * scale)
    wslab = wslab.at[:, W_K:W_K + H].set(p["wk"])
    wslab = wslab.at[:, W_V:W_V + H].set(p["wv"])
    wslab = wslab.at[:, W_O:W_O + H].set(p["wo"])
    wslab = wslab.at[:, W_I:W_I + I].set(p["wi"])

    # head-selector mask: sel[g, d] = 1 iff feature d belongs to head g // R
    g_idx = jnp.arange(G)[:, None]
    d_idx = jnp.arange(H)[None, :]
    sel = ((d_idx // HD) == (g_idx // R)).astype(jnp.float32)          # (G, H)

    misc = jnp.zeros((MISC_ROWS, I), jnp.float32)
    misc = misc.at[ROW_W2:ROW_W2 + I, 0:H].set(p["w2"])
    misc = misc.at[ROW_SEL:ROW_SEL + G, 0:H].set(sel)
    misc = misc.at[ROW_VEC + 0, 0:H].set(p["bq"][0] * scale)
    misc = misc.at[ROW_VEC + 1, 0:H].set(p["bk"][0])
    misc = misc.at[ROW_VEC + 2, 0:H].set(p["bv"][0])
    misc = misc.at[ROW_VEC + 3, 0:H].set(p["bo"][0])
    misc = misc.at[ROW_VEC + 4, 0:H].set(p["g1"][0])
    misc = misc.at[ROW_VEC + 5, 0:H].set(p["be1"][0])
    misc = misc.at[ROW_VEC + 6, 0:I].set(p["bi"][0])
    misc = misc.at[ROW_VEC + 7, 0:H].set(p["b2"][0])
    misc = misc.at[ROW_VEC + 8, 0:H].set(p["g2"][0])
    misc = misc.at[ROW_VEC + 9, 0:H].set(p["be2"][0])
    return {"wslab": wslab, "misc": misc}


def bert_layer(x, mask, packed):
    """x: (B,S,H) f32; mask: (B,1,S) additive; packed: pack_params() output."""
    xf = x.reshape(R, H)
    xpad = jnp.zeros((KPAD, H), jnp.float32).at[0:R, :].set(xf)

    # combined additive mask: user key mask (same batch) + cross-batch / padding block
    key_mask = mask.reshape(B, S).astype(jnp.float32)
    base = jnp.full((B, KPAD), NEG_BIG, jnp.float32)
    for b in range(B):
        base = base.at[b, b * S:(b + 1) * S].set(key_mask[b])
    mask_full = jnp.broadcast_to(base[None, :, None, :],
                                 (NH, B, S, KPAD)).reshape(G, KPAD)

    spec2d = lambda shape: pl.BlockSpec(shape, lambda i: (0, 0))
    fn = pl.pallas_call(
        bert_layer_kernel,
        out_shape=[
            jax.ShapeDtypeStruct((R, H), jnp.float32),
            jax.ShapeDtypeStruct((G, KPAD), jnp.float32),
        ],
        grid_spec=pltpu.PrefetchScalarGridSpec(
            num_scalar_prefetch=0,
            grid=(1,),                       # whole problem fits in a few vregs
            in_specs=[
                spec2d((KPAD, H)),           # zero-padded tokens
                spec2d((G, KPAD)),           # combined additive mask
                spec2d((H, 640)),            # packed weight slab
                spec2d((MISC_ROWS, I)),      # w2 | head-selector | biases/gammas/betas
            ],
            out_specs=[spec2d((R, H)), spec2d((G, KPAD))],
        ),
        compiler_params=pltpu.CompilerParams(
            dimension_semantics=("arbitrary",)),
    )
    out_flat, probs_big = fn(xpad, mask_full, packed["wslab"], packed["misc"])

    layer_out = out_flat.reshape(B, S, H)
    # probs_big rows are (h, b, i), first R columns are (b', j); take b == b'
    # blocks with static slices (no gather kernel).
    pb = probs_big.reshape(NH, B, S, KPAD)[:, :, :, :R].reshape(NH, B, S, B, S)
    probs = jnp.stack([pb[:, b, :, b, :] for b in range(B)], axis=0)   # (B, NH, S, S)
    return layer_out, probs


def bert_layer_ref(x, mask, p):
    """Pure-JAX reference (mirrors the torch forward) for correctness check."""
    q = x @ p["wq"] + p["bq"]
    k = x @ p["wk"] + p["bk"]
    v = x @ p["wv"] + p["bv"]

    def heads(t):  # (B,S,H) -> (B,NH,S,HD)
        return t.reshape(B, S, NH, HD).transpose(0, 2, 1, 3)

    qh, kh, vh = heads(q), heads(k), heads(v)
    qh = qh / math.sqrt(HD)
    scores = jnp.einsum("bhqd,bhkd->bhqk", qh, kh)
    scores = scores + mask[:, None, :, :]          # (B,1,1,S) broadcast
    probs = jax.nn.softmax(scores.astype(jnp.float32), axis=-1)
    ctx = jnp.einsum("bhqk,bhkd->bhqd", probs, vh)
    ctx = ctx.transpose(0, 2, 1, 3).reshape(B, S, H)

    def ln(t, g, b):
        m = jnp.mean(t, axis=-1, keepdims=True)
        var = jnp.mean((t - m) ** 2, axis=-1, keepdims=True)
        return (t - m) * jax.lax.rsqrt(var + EPS) * g + b

    attn = ln(ctx @ p["wo"] + p["bo"] + x, p["g1"], p["be1"])
    inter = attn @ p["wi"] + p["bi"]
    inter = inter * 0.5 * (1.0 + jax.lax.erf(inter / math.sqrt(2.0)))
    out = ln(inter @ p["w2"] + p["b2"] + attn, p["g2"], p["be2"])
    return out, probs


def init_params(key):
    ks = jax.random.split(key, 16)
    s = 0.02
    return {
        "wq": s * jax.random.normal(ks[0], (H, H), jnp.float32),
        "bq": s * jax.random.normal(ks[1], (1, H), jnp.float32),
        "wk": s * jax.random.normal(ks[2], (H, H), jnp.float32),
        "bk": s * jax.random.normal(ks[3], (1, H), jnp.float32),
        "wv": s * jax.random.normal(ks[4], (H, H), jnp.float32),
        "bv": s * jax.random.normal(ks[5], (1, H), jnp.float32),
        "wo": s * jax.random.normal(ks[6], (H, H), jnp.float32),
        "bo": s * jax.random.normal(ks[7], (1, H), jnp.float32),
        "g1": jnp.ones((1, H), jnp.float32) + s * jax.random.normal(ks[8], (1, H)),
        "be1": s * jax.random.normal(ks[9], (1, H), jnp.float32),
        "wi": s * jax.random.normal(ks[10], (H, I), jnp.float32),
        "bi": s * jax.random.normal(ks[11], (1, I), jnp.float32),
        "w2": s * jax.random.normal(ks[12], (I, H), jnp.float32),
        "b2": s * jax.random.normal(ks[13], (1, H), jnp.float32),
        "g2": jnp.ones((1, H), jnp.float32) + s * jax.random.normal(ks[14], (1, H)),
        "be2": s * jax.random.normal(ks[15], (1, H), jnp.float32),
    }


if __name__ == "__main__":
    key = jax.random.PRNGKey(0)
    kx, kp = jax.random.split(key)
    x = jax.random.normal(kx, (B, S, H), jnp.float32)

    # Additive attention mask (B, 1, S): batch 0 attends everywhere,
    # batch 1 has its last 3 key positions masked out.
    mask = jnp.zeros((B, 1, S), jnp.float32)
    mask = mask.at[1, 0, -3:].set(-10000.0)

    params = init_params(kp)
    packed = pack_params(params)

    run = jax.jit(bert_layer)
    layer_out, attn_probs = run(x, mask, packed)
    layer_out = jax.block_until_ready(layer_out)
    attn_probs = jax.block_until_ready(attn_probs)

    ref_out, ref_probs = bert_layer_ref(x, mask, params)
    assert layer_out.shape == (B, S, H)
    assert attn_probs.shape == (B, NH, S, S)
    assert jnp.allclose(layer_out, ref_out, atol=1e-4, rtol=1e-4)
    assert jnp.allclose(attn_probs, ref_probs, atol=1e-5, rtol=1e-4)

    print("KERNEL_OK")
</pallas_src>

<mosaic_0001>
module attributes {stable_mosaic.version = 11 : i64} {
  func.func @bert_layer_kernel(%arg0: i32, %arg1: memref<128x32xf32, #tpu.memory_space<vmem>>, %arg2: memref<64x128xf32, #tpu.memory_space<vmem>>, %arg3: memref<32x640xf32, #tpu.memory_space<vmem>>, %arg4: memref<144x64xf32, #tpu.memory_space<vmem>>, %arg5: memref<16x32xf32, #tpu.memory_space<vmem>>, %arg6: memref<64x128xf32, #tpu.memory_space<vmem>>) attributes {dimension_semantics = [#tpu.dimension_semantics<arbitrary>], iteration_bounds = array<i64: 1>, scalar_prefetch = 0 : i64, scratch_operands = 0 : i64, tpu.core_type = #tpu.core_type<tc>, window_params = [{pipeline_mode = #tpu.pipeline_mode<synchronous>, transform_indices = @transform_0, window_bounds = array<i64: 128, 32>}, {pipeline_mode = #tpu.pipeline_mode<synchronous>, transform_indices = @transform_1, window_bounds = array<i64: 64, 128>}, {pipeline_mode = #tpu.pipeline_mode<synchronous>, transform_indices = @transform_2, window_bounds = array<i64: 32, 640>}, {pipeline_mode = #tpu.pipeline_mode<synchronous>, transform_indices = @transform_3, window_bounds = array<i64: 144, 64>}, {pipeline_mode = #tpu.pipeline_mode<synchronous>, transform_indices = @transform_4, window_bounds = array<i64: 16, 32>}, {pipeline_mode = #tpu.pipeline_mode<synchronous>, transform_indices = @transform_5, window_bounds = array<i64: 64, 128>}]} {
    %c0 = arith.constant 0 : index
    %c0_0 = arith.constant 0 : index
    %0 = vector.load %arg1[%c0, %c0_0] : memref<128x32xf32, #tpu.memory_space<vmem>>, vector<128x32xf32>
    %1 = vector.extract_strided_slice %0 {offsets = [0, 0], sizes = [16, 32], strides = [1, 1]} : vector<128x32xf32> to vector<16x32xf32>
    %c0_1 = arith.constant 0 : index
    %c0_2 = arith.constant 0 : index
    %2 = vector.load %arg2[%c0_1, %c0_2] : memref<64x128xf32, #tpu.memory_space<vmem>>, vector<64x128xf32>
    %c0_3 = arith.constant 0 : index
    %c0_4 = arith.constant 0 : index
    %3 = vector.load %arg3[%c0_3, %c0_4] : memref<32x640xf32, #tpu.memory_space<vmem>>, vector<32x32xf32>
    %c0_5 = arith.constant 0 : index
    %c128 = arith.constant 128 : index
    %4 = vector.load %arg3[%c0_5, %c128] : memref<32x640xf32, #tpu.memory_space<vmem>>, vector<32x32xf32>
    %c0_6 = arith.constant 0 : index
    %c256 = arith.constant 256 : index
    %5 = vector.load %arg3[%c0_6, %c256] : memref<32x640xf32, #tpu.memory_space<vmem>>, vector<32x32xf32>
    %c0_7 = arith.constant 0 : index
    %c384 = arith.constant 384 : index
    %6 = vector.load %arg3[%c0_7, %c384] : memref<32x640xf32, #tpu.memory_space<vmem>>, vector<32x32xf32>
    %c0_8 = arith.constant 0 : index
    %c512 = arith.constant 512 : index
    %7 = vector.load %arg3[%c0_8, %c512] : memref<32x640xf32, #tpu.memory_space<vmem>>, vector<32x64xf32>
    %c0_9 = arith.constant 0 : index
    %c0_10 = arith.constant 0 : index
    %8 = vector.load %arg4[%c0_9, %c0_10] : memref<144x64xf32, #tpu.memory_space<vmem>>, vector<64x32xf32>
    %c64 = arith.constant 64 : index
    %c0_11 = arith.constant 0 : index
    %9 = vector.load %arg4[%c64, %c0_11] : memref<144x64xf32, #tpu.memory_space<vmem>>, vector<64x32xf32>
    %c128_12 = arith.constant 128 : index
    %c0_13 = arith.constant 0 : index
    %10 = vector.load %arg4[%c128_12, %c0_13] : memref<144x64xf32, #tpu.memory_space<vmem>>, vector<16x64xf32>
    %11 = vector.extract_strided_slice %10 {offsets = [0, 0], sizes = [1, 32], strides = [1, 1]} : vector<16x64xf32> to vector<1x32xf32>
    %12 = vector.extract_strided_slice %10 {offsets = [1, 0], sizes = [1, 32], strides = [1, 1]} : vector<16x64xf32> to vector<1x32xf32>
    %13 = vector.extract_strided_slice %10 {offsets = [2, 0], sizes = [1, 32], strides = [1, 1]} : vector<16x64xf32> to vector<1x32xf32>
    %14 = vector.extract_strided_slice %10 {offsets = [3, 0], sizes = [1, 32], strides = [1, 1]} : vector<16x64xf32> to vector<1x32xf32>
    %15 = vector.extract_strided_slice %10 {offsets = [4, 0], sizes = [1, 32], strides = [1, 1]} : vector<16x64xf32> to vector<1x32xf32>
    %16 = vector.extract_strided_slice %10 {offsets = [5, 0], sizes = [1, 32], strides = [1, 1]} : vector<16x64xf32> to vector<1x32xf32>
    %17 = vector.extract_strided_slice %10 {offsets = [6, 0], sizes = [1, 64], strides = [1, 1]} : vector<16x64xf32> to vector<1x64xf32>
    %18 = vector.extract_strided_slice %10 {offsets = [7, 0], sizes = [1, 32], strides = [1, 1]} : vector<16x64xf32> to vector<1x32xf32>
    %19 = vector.extract_strided_slice %10 {offsets = [8, 0], sizes = [1, 32], strides = [1, 1]} : vector<16x64xf32> to vector<1x32xf32>
    %20 = vector.extract_strided_slice %10 {offsets = [9, 0], sizes = [1, 32], strides = [1, 1]} : vector<16x64xf32> to vector<1x32xf32>
    %cst = arith.constant dense<0.000000e+00> : vector<16x32xf32>
    %21 = tpu.matmul %1, %3, %cst {dimension_numbers = #tpu.dot_dimension_numbers<[1], [0], [0], [1], [0, 0, 1, 1], [], []>} : vector<16x32xf32>, vector<32x32xf32>, vector<16x32xf32> -> vector<16x32xf32>
    %22 = vector.broadcast %11 : vector<1x32xf32> to vector<16x32xf32>
    %23 = arith.addf %21, %22 : vector<16x32xf32>
    %cst_14 = arith.constant dense<0.000000e+00> : vector<128x32xf32>
    %24 = tpu.matmul %0, %4, %cst_14 {dimension_numbers = #tpu.dot_dimension_numbers<[1], [0], [0], [1], [0, 0, 1, 1], [], []>} : vector<128x32xf32>, vector<32x32xf32>, vector<128x32xf32> -> vector<128x32xf32>
    %25 = vector.broadcast %12 : vector<1x32xf32> to vector<128x32xf32>
    %26 = arith.addf %24, %25 : vector<128x32xf32>
    %cst_15 = arith.constant dense<0.000000e+00> : vector<128x32xf32>
    %27 = tpu.matmul %0, %5, %cst_15 {dimension_numbers = #tpu.dot_dimension_numbers<[1], [0], [0], [1], [0, 0, 1, 1], [], []>} : vector<128x32xf32>, vector<32x32xf32>, vector<128x32xf32> -> vector<128x32xf32>
    %28 = vector.broadcast %13 : vector<1x32xf32> to vector<128x32xf32>
    %29 = arith.addf %27, %28 : vector<128x32xf32>
    %30 = vector.shape_cast %9 : vector<64x32xf32> to vector<4x16x32xf32>
    %31 = vector.shape_cast %23 : vector<16x32xf32> to vector<1x16x32xf32>
    %32 = vector.broadcast %31 : vector<1x16x32xf32> to vector<4x16x32xf32>
    %33 = arith.mulf %32, %30 : vector<4x16x32xf32>
    %34 = vector.shape_cast %33 : vector<4x16x32xf32> to vector<64x32xf32>
    "tpu.trace_start"() <{level = 10 : i32, message = "gd,kd->gk"}> : () -> ()
    %cst_16 = arith.constant dense<0.000000e+00> : vector<64x128xf32>
    %35 = tpu.matmul %34, %26, %cst_16 {dimension_numbers = #tpu.dot_dimension_numbers<[1], [1], [0], [0], [0, 0, 1, 0], [], []>} : vector<64x32xf32>, vector<128x32xf32>, vector<64x128xf32> -> vector<64x128xf32>
    "tpu.trace_stop"() : () -> ()
    %36 = arith.addf %35, %2 : vector<64x128xf32>
    %cst_17 = arith.constant dense<0xFF800000> : vector<64xf32>
    %37 = vector.multi_reduction <maximumf>, %36, %cst_17 [1] : vector<64x128xf32> to vector<64xf32>
    %38 = vector.shape_cast %37 : vector<64xf32> to vector<64x1xf32>
    %39 = vector.broadcast %38 : vector<64x1xf32> to vector<64x128xf32>
    %40 = arith.subf %36, %39 : vector<64x128xf32>
    %41 = math.exp %40 : vector<64x128xf32>
    %cst_18 = arith.constant dense<0.000000e+00> : vector<64xf32>
    %42 = vector.multi_reduction <add>, %41, %cst_18 [1] : vector<64x128xf32> to vector<64xf32>
    %43 = vector.shape_cast %42 : vector<64xf32> to vector<64x1xf32>
    %44 = vector.broadcast %43 : vector<64x1xf32> to vector<64x128xf32>
    %45 = arith.divf %41, %44 : vector<64x128xf32>
    %cst_19 = arith.constant -5.000000e+08 : f32
    %46 = vector.broadcast %cst_19 : f32 to vector<64x128xf32>
    %47 = arith.cmpf ogt, %2, %46 : vector<64x128xf32>
    %cst_20 = arith.constant 0.000000e+00 : f32
    %48 = vector.broadcast %cst_20 : f32 to vector<64x128xf32>
    %49 = arith.select %47, %45, %48 : vector<64x128xi1>, vector<64x128xf32>
    %c0_21 = arith.constant 0 : index
    %c0_22 = arith.constant 0 : index
    %50 = vector.load %arg6[%c0_21, %c0_22] : memref<64x128xf32, #tpu.memory_space<vmem>>, vector<64x128xf32>
    tpu.vector_store %arg6[%c0_21, %c0_22], %49 {strides = array<i32>} : memref<64x128xf32, #tpu.memory_space<vmem>>, vector<64x128xf32>,
    %cst_23 = arith.constant dense<0.000000e+00> : vector<64x32xf32>
    %51 = tpu.matmul %49, %29, %cst_23 {dimension_numbers = #tpu.dot_dimension_numbers<[1], [0], [0], [1], [0, 0, 1, 1], [], []>} : vector<64x128xf32>, vector<128x32xf32>, vector<64x32xf32> -> vector<64x32xf32>
    %52 = vector.shape_cast %51 : vector<64x32xf32> to vector<4x16x32xf32>
    %53 = arith.mulf %52, %30 : vector<4x16x32xf32>
    %cst_24 = arith.constant dense<0.000000e+00> : vector<16x32xf32>
    %54 = vector.multi_reduction <add>, %53, %cst_24 [0] : vector<4x16x32xf32> to vector<16x32xf32>
    %cst_25 = arith.constant dense<0.000000e+00> : vector<16x32xf32>
    %55 = tpu.matmul %54, %6, %cst_25 {dimension_numbers = #tpu.dot_dimension_numbers<[1], [0], [0], [1], [0, 0, 1, 1], [], []>} : vector<16x32xf32>, vector<32x32xf32>, vector<16x32xf32> -> vector<16x32xf32>
    %56 = vector.broadcast %14 : vector<1x32xf32> to vector<16x32xf32>
    %57 = arith.addf %55, %56 : vector<16x32xf32>
    %58 = arith.addf %57, %1 : vector<16x32xf32>
    %cst_26 = arith.constant dense<0.000000e+00> : vector<16xf32>
    %59 = vector.multi_reduction <add>, %58, %cst_26 [1] : vector<16x32xf32> to vector<16xf32>
    %60 = vector.shape_cast %59 : vector<16xf32> to vector<16x1xf32>
    %cst_27 = arith.constant 3.200000e+01 : f32
    %61 = vector.broadcast %cst_27 : f32 to vector<16x1xf32>
    %62 = arith.divf %60, %61 : vector<16x1xf32>
    %63 = vector.broadcast %62 : vector<16x1xf32> to vector<16x32xf32>
    %64 = arith.subf %58, %63 : vector<16x32xf32>
    %65 = arith.mulf %64, %64 : vector<16x32xf32>
    %cst_28 = arith.constant dense<0.000000e+00> : vector<16xf32>
    %66 = vector.multi_reduction <add>, %65, %cst_28 [1] : vector<16x32xf32> to vector<16xf32>
    %67 = vector.shape_cast %66 : vector<16xf32> to vector<16x1xf32>
    %cst_29 = arith.constant 3.200000e+01 : f32
    %68 = vector.broadcast %cst_29 : f32 to vector<16x1xf32>
    %69 = arith.divf %67, %68 : vector<16x1xf32>
    %70 = vector.broadcast %62 : vector<16x1xf32> to vector<16x32xf32>
    %71 = arith.subf %58, %70 : vector<16x32xf32>
    %cst_30 = arith.constant 9.99999974E-6 : f32
    %72 = vector.broadcast %cst_30 : f32 to vector<16x1xf32>
    %73 = arith.addf %69, %72 : vector<16x1xf32>
    %74 = math.rsqrt %73 : vector<16x1xf32>
    %75 = vector.broadcast %74 : vector<16x1xf32> to vector<16x32xf32>
    %76 = arith.mulf %71, %75 : vector<16x32xf32>
    %77 = vector.broadcast %15 : vector<1x32xf32> to vector<16x32xf32>
    %78 = arith.mulf %76, %77 : vector<16x32xf32>
    %79 = vector.broadcast %16 : vector<1x32xf32> to vector<16x32xf32>
    %80 = arith.addf %78, %79 : vector<16x32xf32>
    %cst_31 = arith.constant dense<0.000000e+00> : vector<16x64xf32>
    %81 = tpu.matmul %80, %7, %cst_31 {dimension_numbers = #tpu.dot_dimension_numbers<[1], [0], [0], [1], [0, 0, 1, 1], [], []>} : vector<16x32xf32>, vector<32x64xf32>, vector<16x64xf32> -> vector<16x64xf32>
    %82 = vector.broadcast %17 : vector<1x64xf32> to vector<16x64xf32>
    %83 = arith.addf %81, %82 : vector<16x64xf32>
    %cst_32 = arith.constant 5.000000e-01 : f32
    %84 = vector.broadcast %cst_32 : f32 to vector<16x64xf32>
    %85 = arith.mulf %83, %84 : vector<16x64xf32>
    %cst_33 = arith.constant 1.41421354 : f32
    %86 = vector.broadcast %cst_33 : f32 to vector<16x64xf32>
    %87 = arith.divf %83, %86 : vector<16x64xf32>
    %88 = math.erf %87 : vector<16x64xf32>
    %cst_34 = arith.constant 1.000000e+00 : f32
    %89 = vector.broadcast %cst_34 : f32 to vector<16x64xf32>
    %90 = arith.addf %89, %88 : vector<16x64xf32>
    %91 = arith.mulf %85, %90 : vector<16x64xf32>
    %cst_35 = arith.constant dense<0.000000e+00> : vector<16x32xf32>
    %92 = tpu.matmul %91, %8, %cst_35 {dimension_numbers = #tpu.dot_dimension_numbers<[1], [0], [0], [1], [0, 0, 1, 1], [], []>} : vector<16x64xf32>, vector<64x32xf32>, vector<16x32xf32> -> vector<16x32xf32>
    %93 = vector.broadcast %18 : vector<1x32xf32> to vector<16x32xf32>
    %94 = arith.addf %92, %93 : vector<16x32xf32>
    %95 = arith.addf %94, %80 : vector<16x32xf32>
    %cst_36 = arith.constant dense<0.000000e+00> : vector<16xf32>
    %96 = vector.multi_reduction <add>, %95, %cst_36 [1] : vector<16x32xf32> to vector<16xf32>
    %97 = vector.shape_cast %96 : vector<16xf32> to vector<16x1xf32>
    %cst_37 = arith.constant 3.200000e+01 : f32
    %98 = vector.broadcast %cst_37 : f32 to vector<16x1xf32>
    %99 = arith.divf %97, %98 : vector<16x1xf32>
    %100 = vector.broadcast %99 : vector<16x1xf32> to vector<16x32xf32>
    %101 = arith.subf %95, %100 : vector<16x32xf32>
    %102 = arith.mulf %101, %101 : vector<16x32xf32>
    %cst_38 = arith.constant dense<0.000000e+00> : vector<16xf32>
    %103 = vector.multi_reduction <add>, %102, %cst_38 [1] : vector<16x32xf32> to vector<16xf32>
    %104 = vector.shape_cast %103 : vector<16xf32> to vector<16x1xf32>
    %cst_39 = arith.constant 3.200000e+01 : f32
    %105 = vector.broadcast %cst_39 : f32 to vector<16x1xf32>
    %106 = arith.divf %104, %105 : vector<16x1xf32>
    %107 = vector.broadcast %99 : vector<16x1xf32> to vector<16x32xf32>
    %108 = arith.subf %95, %107 : vector<16x32xf32>
    %cst_40 = arith.constant 9.99999974E-6 : f32
    %109 = vector.broadcast %cst_40 : f32 to vector<16x1xf32>
    %110 = arith.addf %106, %109 : vector<16x1xf32>
    %111 = math.rsqrt %110 : vector<16x1xf32>
    %112 = vector.broadcast %111 : vector<16x1xf32> to vector<16x32xf32>
    %113 = arith.mulf %108, %112 : vector<16x32xf32>
    %114 = vector.broadcast %19 : vector<1x32xf32> to vector<16x32xf32>
    %115 = arith.mulf %113, %114 : vector<16x32xf32>
    %116 = vector.broadcast %20 : vector<1x32xf32> to vector<16x32xf32>
    %117 = arith.addf %115, %116 : vector<16x32xf32>
    %c0_41 = arith.constant 0 : index
    %c0_42 = arith.constant 0 : index
    %118 = vector.load %arg5[%c0_41, %c0_42] : memref<16x32xf32, #tpu.memory_space<vmem>>, vector<16x32xf32>
    tpu.vector_store %arg5[%c0_41, %c0_42], %117 {strides = array<i32>} : memref<16x32xf32, #tpu.memory_space<vmem>>, vector<16x32xf32>,
    return
  }
  func.func @transform_0(%arg0: i32) -> (i32, i32) {
    %c0_i32 = arith.constant 0 : i32
    %c0_i32_0 = arith.constant 0 : i32
    %c0_i32_1 = arith.constant 0 : i32
    return %c0_i32, %c0_i32_0 : i32, i32
  }
  func.func @transform_1(%arg0: i32) -> (i32, i32) {
    %c0_i32 = arith.constant 0 : i32
    %c0_i32_0 = arith.constant 0 : i32
    %c0_i32_1 = arith.constant 0 : i32
    return %c0_i32, %c0_i32_0 : i32, i32
  }
  func.func @transform_2(%arg0: i32) -> (i32, i32) {
    %c0_i32 = arith.constant 0 : i32
    %c0_i32_0 = arith.constant 0 : i32
    %c0_i32_1 = arith.constant 0 : i32
    return %c0_i32, %c0_i32_0 : i32, i32
  }
  func.func @transform_3(%arg0: i32) -> (i32, i32) {
    %c0_i32 = arith.constant 0 : i32
    %c0_i32_0 = arith.constant 0 : i32
    %c0_i32_1 = arith.constant 0 : i32
    return %c0_i32, %c0_i32_0 : i32, i32
  }
  func.func @transform_4(%arg0: i32) -> (i32, i32) {
    %c0_i32 = arith.constant 0 : i32
    %c0_i32_0 = arith.constant 0 : i32
    %c0_i32_1 = arith.constant 0 : i32
    return %c0_i32, %c0_i32_0 : i32, i32
  }
  func.func @transform_5(%arg0: i32) -> (i32, i32) {
    %c0_i32 = arith.constant 0 : i32
    %c0_i32_0 = arith.constant 0 : i32
    %c0_i32_1 = arith.constant 0 : i32
    return %c0_i32, %c0_i32_0 : i32, i32
  }
}

</mosaic_0001>

<bundles_post_ra>
// kernel: bert_layer.1
= control target key start
LH: loop header
LB: loop body
LE: loop exit
PB: predicated region body
PF: predicated region fallthrough
CT: control target
= control target key end

     0   :  { %s1742_s0 = inlined_call_operand.vmem [shape: f32[128,32], index: 0, kind: input, shape index: {}]   ;;  %s1743_s1 = inlined_call_operand.vmem [shape: f32[64,128], index: 1, kind: input, shape index: {}]   ;;  %s1744_s2 = inlined_call_operand.vmem [shape: f32[32,640], index: 2, kind: input, shape index: {}]   ;;  %s1745_s3 = inlined_call_operand.vmem [shape: f32[144,64], index: 3, kind: input, shape index: {}]   ;;  %s1746_s4 = inlined_call_operand.hbm [shape: f32[16,32], index: 4, kind: output, shape index: {0}]   ;;  %s1747_s5 = inlined_call_operand.vmem [shape: f32[64,128], index: 5, kind: output, shape index: {1}]  }
   0x1   :  { %v51_v0 = vld [vmem:[%s1744_s2 + $0x80] sm:$0xff]  ;;  %v50_v1 = vld [vmem:[%s1744_s2 + $0x58] sm:$0xff]  ;;  %v49_v2 = vld [vmem:[%s1744_s2 + $0x30] sm:$0xff] }
   0x2   :  { %168 = vmatpush.msra.mxu1 %v51_v0 }
   0x4   :  { %169 = vmatpush.msra.mxu1 %v50_v1 }
   0x5   :  { %11 = vsyncpa [#allocation3], 0  ;;  %v48_v3 = vld [vmem:[%s1744_s2 + $0x8] sm:$0xff]  ;;  %v1196_v4 = vld [vmem:[%s1742_s0] sm:$0xff]  ;;  %vm83_vm0 = vcmask 261120   ;;  %s976_s29 = sshll.u32 %s1746_s4, 4  ;;  %s977_s29 = int_to_ptr.hbm [resolvable:$true] %s976_s29 }
   0x6   :  { %170 = vmatpush.msra.mxu1 %v49_v2  ;;  %v1203_v5 = vld [vmem:[%s1742_s0 + $0x8] sm:$0xff]  ;;  %v1210_v6 = vld [vmem:[%s1742_s0 + $0x10] sm:$0xff]  ;;  %v1217_v7 = vld [vmem:[%s1742_s0 + $0x18] sm:$0xff]  ;;  %s1149_s30 = smov 128  }
   0x7   :  { %v1224_v8 = vld [vmem:[%s1742_s0 + $0x20] sm:$0xff]  ;;  %v1231_v9 = vld [vmem:[%s1742_s0 + $0x28] sm:$0xff]  ;;  %v1238_v10 = vld [vmem:[%s1742_s0 + $0x30] sm:$0xff] }
   0x8   :  { %171 = vmatpush.msra.mxu1 %v48_v3  ;;  %v1245_v11 = vld [vmem:[%s1742_s0 + $0x38] sm:$0xff]  ;;  %v1252_v12 = vld [vmem:[%s1742_s0 + $0x40] sm:$0xff]  ;;  %v1259_v13 = vld [vmem:[%s1742_s0 + $0x48] sm:$0xff] }
   0x9   :  { %994 = vmatmul.msk.f32.vlgmr.msra.gmra.mxu1 %vm83_vm0, %v1196_v4  ;;  %v1266_v14 = vld [vmem:[%s1742_s0 + $0x50] sm:$0xff]  ;;  %v1273_v15 = vld [vmem:[%s1742_s0 + $0x58] sm:$0xff]  ;;  %v1280_v16 = vld [vmem:[%s1742_s0 + $0x60] sm:$0xff] }
   0xa   :  { %v1287_v17 = vld [vmem:[%s1742_s0 + $0x68] sm:$0xff]  ;;  %v1294_v18 = vld [vmem:[%s1742_s0 + $0x70] sm:$0xff]  ;;  %v1301_v19 = vld [vmem:[%s1742_s0 + $0x78] sm:$0xff] }
   0xb   :  { %v47_v23 = vld [vmem:[%s1744_s2 + $0x78] sm:$0xff]  ;;  %v46_v24 = vld [vmem:[%s1744_s2 + $0x50] sm:$0xff]  ;;  %v45_v25 = vld [vmem:[%s1744_s2 + $0x28] sm:$0xff] }
   0xc   :  { %102 = vmatpush.msra.mxu0 %v47_v23  ;;  %v44_v26 = vld [vmem:[%s1744_s2] sm:$0xff]  ;;  %v55_v38 = vld [vmem:[%s1744_s2 + $0x88] sm:$0xff]  ;;  %v53_v40 = vld [vmem:[%s1744_s2 + $0x38] sm:$0xff] }
   0xd   :  { %v54_v39 = vld [vmem:[%s1744_s2 + $0x60] sm:$0xff]  ;;  %234 = vmatpush.msra.mxu2 %v55_v38  ;;  %v52_v41 = vld [vmem:[%s1744_s2 + $0x10] sm:$0xff] }
   0xe   :  { %103 = vmatpush.msra.mxu0 %v46_v24  ;;  %v1344_v43 = vld [vmem:[%s1745_s3 + $0x80] sm:$0xff]  ;;  %v1484_v38 = vld [vmem:[%s1743_s1 + $0x10] sm:$0xff] }
   0xf   :  { %235 = vmatpush.msra.mxu2 %v54_v39  ;;  %v113_v44 = vperm.slane %v1344_v43, 1  ;;  %v82_v61 = vperm.slane %v1344_v43, 0  ;;  %v1382_v0 = vld [vmem:[%s1745_s3 + $0x40] sm:$0xff]  ;;  %vm586_vm15 = vcmp.gt.f32.partialorder %v1484_v38, -5e+08 }
  0x10   :  { %104 = vmatpush.msra.mxu0 %v45_v25 }
  0x11   :  { %995 = vmatmul.msk.f32.gmra.mxu1 %vm83_vm0, %v1203_v5  ;;  %236 = vmatpush.msra.mxu2 %v53_v40 }
  0x12   :  { %105 = vmatpush.msra.mxu0 %v44_v26 }
  0x13   :  { %992 = vmatmul.msk.f32.vlgmr.msra.gmra.mxu0 %vm83_vm0, %v1196_v4  ;;  %237 = vmatpush.msra.mxu2 %v52_v41 }
  0x14   :  { %1010 = vmatmul.msk.f32.vlgmr.msra.gmra.mxu2 %vm83_vm0, %v1196_v4 }
  0x19   :  { %996 = vmatmul.msk.f32.gmra.mxu1 %vm83_vm0, %v1210_v6 }
  0x1b   :  { %993 = vmatmul.msk.f32.gmra.mxu0 %vm83_vm0, %v1203_v5 }
  0x1c   :  { %1011 = vmatmul.msk.f32.gmra.mxu2 %vm83_vm0, %v1203_v5 }
  0x21   :  { %997 = vmatmul.msk.f32.gmra.mxu1 %vm83_vm0, %v1217_v7 }
  0x24   :  { %1012 = vmatmul.msk.f32.gmra.mxu2 %vm83_vm0, %v1210_v6 }
  0x29   :  { %998 = vmatmul.msk.f32.gmra.mxu1 %vm83_vm0, %v1224_v8 }
  0x2c   :  { %1013 = vmatmul.msk.f32.gmra.mxu2 %vm83_vm0, %v1217_v7  ;;  %v1393_v7 = vld [vmem:[%s1745_s3 + $0x48] sm:$0xff] }
  0x31   :  { %999 = vmatmul.msk.f32.gmra.mxu1 %vm83_vm0, %v1231_v9 }
  0x34   :  { %1014 = vmatmul.msk.f32.gmra.mxu2 %vm83_vm0, %v1224_v8 }
  0x39   :  { %1000 = vmatmul.msk.f32.gmra.mxu1 %vm83_vm0, %v1238_v10 }
  0x3c   :  { %1015 = vmatmul.msk.f32.gmra.mxu2 %vm83_vm0, %v1231_v9  ;;  %v1404_v9 = vld [vmem:[%s1745_s3 + $0x50] sm:$0xff] }
  0x41   :  { %1001 = vmatmul.msk.f32.gmra.mxu1 %vm83_vm0, %v1245_v11 }
  0x44   :  { %1016 = vmatmul.msk.f32.gmra.mxu2 %vm83_vm0, %v1238_v10 }
  0x49   :  { %1002 = vmatmul.msk.f32.gmra.mxu1 %vm83_vm0, %v1252_v12 }
  0x4c   :  { %1017 = vmatmul.msk.f32.gmra.mxu2 %vm83_vm0, %v1245_v11  ;;  %v1413_v11 = vld [vmem:[%s1745_s3 + $0x58] sm:$0xff] }
  0x51   :  { %1003 = vmatmul.msk.f32.gmra.mxu1 %vm83_vm0, %v1259_v13 }
  0x54   :  { %1018 = vmatmul.msk.f32.gmra.mxu2 %vm83_vm0, %v1252_v12 }
  0x59   :  { %1004 = vmatmul.msk.f32.gmra.mxu1 %vm83_vm0, %v1266_v14 }
  0x5c   :  { %1019 = vmatmul.msk.f32.gmra.mxu2 %vm83_vm0, %v1259_v13  ;;  %v1422_v13 = vld [vmem:[%s1745_s3 + $0x60] sm:$0xff] }
  0x61   :  { %1005 = vmatmul.msk.f32.gmra.mxu1 %vm83_vm0, %v1273_v15 }
  0x64   :  { %1020 = vmatmul.msk.f32.gmra.mxu2 %vm83_vm0, %v1266_v14 }
  0x69   :  { %1006 = vmatmul.msk.f32.gmra.mxu1 %vm83_vm0, %v1280_v16 }
  0x6c   :  { %1021 = vmatmul.msk.f32.gmra.mxu2 %vm83_vm0, %v1273_v15  ;;  %v1431_v15 = vld [vmem:[%s1745_s3 + $0x68] sm:$0xff] }
  0x71   :  { %1007 = vmatmul.msk.f32.gmra.mxu1 %vm83_vm0, %v1287_v17 }
  0x74   :  { %1022 = vmatmul.msk.f32.gmra.mxu2 %vm83_vm0, %v1280_v16  ;;  %v1440_v16 = vld [vmem:[%s1745_s3 + $0x70] sm:$0xff] }
  0x79   :  { %1008 = vmatmul.msk.f32.gmra.mxu1 %vm83_vm0, %v1294_v18 }
  0x7c   :  { %1023 = vmatmul.msk.f32.gmra.mxu2 %vm83_vm0, %v1287_v17  ;;  %v1449_v17 = vld [vmem:[%s1745_s3 + $0x78] sm:$0xff] }
  0x81   :  { %1009 = vmatmul.msk.f32.gmra.mxu1 %vm83_vm0, %v1301_v19 }
  0x84   :  { %1024 = vmatmul.msk.f32.gmra.mxu2 %vm83_vm0, %v1294_v18 }
  0x86   :  { %v1305_v20 = vpop.f32.mrf.mxu1 }
  0x87   :  { %v174_v1 = vadd.f32 %v1305_v20, %v113_v44 }
  0x8c   :  { %1025 = vmatmul.msk.f32.gmra.mxu2 %vm83_vm0, %v1301_v19 }
  0x8e   :  { %v1307_v21 = vpop.f32.mrf.mxu1 }
  0x8f   :  { %v177_v62 = vadd.f32 %v1307_v21, %v113_v44 }
  0x90   :  { %v107_v60 = vpop.f32.mrf.mxu0 }
  0x91   :  { %v108_v63 = vadd.f32 %v107_v60, %v82_v61 }
  0x93   :  { %v287_v2 = vmul.f32 %v108_v63, %v1382_v0  ;;  %v289_v10 = vmul.f32 %v108_v63, %v1404_v9  ;;  %v291_v14 = vmul.f32 %v108_v63, %v1422_v13  ;;  %v293_v21 = vmul.f32 %v108_v63, %v1440_v16  ;;  %v1530_v63 = vld [vmem:[%s1743_s1 + $0x38] sm:$0xff] }
  0x96   :  { %v1309_v22 = vpop.f32.mrf.mxu1 }
  0x97   :  { %v180_v59 = vadd.f32 %v1309_v22, %v113_v44  ;;  %v1453_v18 = vpop.f32.mrf.mxu2 }
  0x98   :  { %v110_v3 = vpop.f32.mrf.mxu0 }
  0x99   :  { %v111_v6 = vadd.f32 %v110_v3, %v82_v61 }
  0x9b   :  { %v288_v8 = vmul.f32 %v111_v6, %v1393_v7  ;;  %v290_v12 = vmul.f32 %v111_v6, %v1413_v11  ;;  %v292_v20 = vmul.f32 %v111_v6, %v1431_v15  ;;  %v294_v22 = vmul.f32 %v111_v6, %v1449_v17 }
  0x9e   :  { %v182_v27 = vpop.f32.mrf.mxu1 }
  0x9f   :  { %v183_v58 = vadd.f32 %v182_v27, %v113_v44  ;;  %v1455_v23 = vpop.f32.mrf.mxu2 }
  0xa6   :  { %v185_v28 = vpop.f32.mrf.mxu1 }
  0xa7   :  { %v186_v57 = vadd.f32 %v185_v28, %v113_v44  ;;  %v1457_v24 = vpop.f32.mrf.mxu2 }
  0xae   :  { %v188_v29 = vpop.f32.mrf.mxu1 }
  0xaf   :  { %v189_v56 = vadd.f32 %v188_v29, %v113_v44  ;;  %v1459_v25 = vpop.f32.mrf.mxu2 }
  0xb6   :  { %v191_v30 = vpop.f32.mrf.mxu1 }
  0xb7   :  { %v192_v55 = vadd.f32 %v191_v30, %v113_v44  ;;  %v1461_v26 = vpop.f32.mrf.mxu2  ;;  %v1466_v30 = vld [vmem:[%s1743_s1] sm:$0xff] }
  0xb8   :  { %vm584_vm5 = vcmp.gt.f32.partialorder %v1466_v30, -5e+08 }
  0xbe   :  { %v194_v31 = vpop.f32.mrf.mxu1 }
  0xbf   :  { %v195_v54 = vadd.f32 %v194_v31, %v113_v44  ;;  %v254_v19 = vpop.f32.mrf.mxu2 }
  0xc6   :  { %v197_v32 = vpop.f32.mrf.mxu1 }
  0xc7   :  { %v198_v53 = vadd.f32 %v197_v32, %v113_v44  ;;  %v257_v27 = vpop.f32.mrf.mxu2 }
  0xce   :  { %v200_v33 = vpop.f32.mrf.mxu1 }
  0xcf   :  { %v201_v52 = vadd.f32 %v200_v33, %v113_v44  ;;  %v260_v28 = vpop.f32.mrf.mxu2 }
  0xd6   :  { %v203_v34 = vpop.f32.mrf.mxu1 }
  0xd7   :  { %v204_v51 = vadd.f32 %v203_v34, %v113_v44  ;;  %v263_v29 = vpop.f32.mrf.mxu2  ;;  %v1475_v34 = vld [vmem:[%s1743_s1 + $0x8] sm:$0xff] }
  0xd8   :  { %vm585_vm10 = vcmp.gt.f32.partialorder %v1475_v34, -5e+08 }
  0xde   :  { %v206_v35 = vpop.f32.mrf.mxu1 }
  0xdf   :  { %v207_v50 = vadd.f32 %v206_v35, %v113_v44  ;;  %v266_v33 = vpop.f32.mrf.mxu2 }
  0xe6   :  { %v209_v36 = vpop.f32.mrf.mxu1 }
  0xe7   :  { %v210_v49 = vadd.f32 %v209_v36, %v113_v44 }
  0xee   :  { %v212_v37 = vpop.f32.mrf.mxu1 }
  0xef   :  { %v213_v48 = vadd.f32 %v212_v37, %v113_v44  ;;  %v269_v37 = vpop.f32.mrf.mxu2 }
  0xf6   :  { %v215_v42 = vpop.f32.mrf.mxu1 }
  0xf7   :  { %v216_v47 = vadd.f32 %v215_v42, %v113_v44  ;;  %v272_v41 = vpop.f32.mrf.mxu2  ;;  %v1493_v42 = vld [vmem:[%s1743_s1 + $0x18] sm:$0xff] }
  0xfe   :  { %v218_v45 = vpop.f32.mrf.mxu1 }
  0xff   :  { %v219_v46 = vadd.f32 %v218_v45, %v113_v44 }
 0x101   :  { %1026 = vmatpush.xpose.msk.msra.mxu3 %vm83_vm0, %v219_v46  ;;  %v275_v46 = vpop.f32.mrf.mxu2 }
 0x105   :  { %1027 = vmatpush.xpose.msk.msra.mxu3 %vm83_vm0, %v216_v47  ;;  %v1502_v47 = vld [vmem:[%s1743_s1 + $0x20] sm:$0xff] }
 0x109   :  { %1028 = vmatpush.xpose.msk.msra.mxu3 %vm83_vm0, %v213_v48 }
 0x10d   :  { %1029 = vmatpush.xpose.msk.msra.mxu3 %vm83_vm0, %v210_v49 }
 0x111   :  { %1030 = vmatpush.xpose.msk.msra.mxu3 %vm83_vm0, %v207_v50  ;;  %v278_v50 = vpop.f32.mrf.mxu2 }
 0x115   :  { %1031 = vmatpush.xpose.msk.msra.mxu3 %vm83_vm0, %v204_v51  ;;  %v1511_v51 = vld [vmem:[%s1743_s1 + $0x28] sm:$0xff] }
 0x119   :  { %1032 = vmatpush.xpose.msk.msra.mxu3 %vm83_vm0, %v201_v52 }
 0x11d   :  { %1033 = vmatpush.xpose.msk.msra.mxu3 %vm83_vm0, %v198_v53 }
 0x121   :  { %1034 = vmatpush.xpose.msk.msra.mxu3 %vm83_vm0, %v195_v54  ;;  %v281_v54 = vpop.f32.mrf.mxu2 }
 0x125   :  { %1035 = vmatpush.xpose.msk.msra.mxu3 %vm83_vm0, %v192_v55  ;;  %v221_v55 = vperm.slane %v1344_v43, 2 }
 0x127   :  { %v282_v60 = vadd.f32 %v281_v54, %v221_v55 }
 0x129   :  { %1036 = vmatpush.xpose.msk.msra.mxu3 %vm83_vm0, %v189_v56  ;;  %v1521_v56 = vld [vmem:[%s1743_s1 + $0x30] sm:$0xff]  ;;  %s1150_s1 = smov 8  }
 0x12d   :  { %1037 = vmatpush.xpose.msk.msra.mxu3 %vm83_vm0, %v186_v57 }
 0x131   :  { %1038 = vmatpush.xpose.msk.msra.mxu3 %vm83_vm0, %v183_v58 }
 0x135   :  { %1039 = vmatpush.xpose.msk.msra.mxu3 %vm83_vm0, %v180_v59  ;;  %v284_v59 = vpop.f32.mrf.mxu2 }
 0x136   :  { %v285_v61 = vadd.f32 %v284_v59, %v221_v55 }
 0x138   :  { %608 = vmatpush.msrb.mxu0 %v285_v61 }
 0x139   :  { %1040 = vmatpush.xpose.msk.msra.mxu3 %vm83_vm0, %v177_v62  ;;  %v279_v62 = vadd.f32 %v278_v50, %v221_v55 }
 0x13a   :  { %609 = vmatpush.msrb.mxu0 %v282_v60 }
 0x13c   :  { %610 = vmatpush.msrb.mxu0 %v279_v62 }
 0x13d   :  { %1041 = vmatpush.xpose.msk.msra.mxu3 %vm83_vm0, %v174_v1  ;;  %v276_v1 = vadd.f32 %v275_v46, %v221_v55 }
 0x13f   :  { %611 = vmatpush.msrb.mxu0 %v276_v1 }
 0x140   :  { %1042 = vmatmul.msk.f32.vlgmr.msra.gmra.mxu3 %vm83_vm0, %v287_v2  ;;  %v273_v2 = vadd.f32 %v272_v41, %v221_v55 }
 0x142   :  { %612 = vmatpush.msrb.mxu0 %v273_v2 }
 0x148   :  { %1043 = vmatmul.msk.f32.gmra.mxu3 %vm83_vm0, %v288_v8  ;;  %v270_v8 = vadd.f32 %v269_v37, %v221_v55 }
 0x14a   :  { %613 = vmatpush.msrb.mxu0 %v270_v8 }
 0x150   :  { %1044 = vmatmul.msk.f32.gmra.mxu3 %vm83_vm0, %v289_v10  ;;  %v267_v10 = vadd.f32 %v266_v33, %v221_v55  ;;  %v243_v33 = vadd.f32 %v1455_v23, %v221_v55 }
 0x152   :  { %614 = vmatpush.msrb.mxu0 %v267_v10 }
 0x158   :  { %1045 = vmatmul.msk.f32.gmra.mxu3 %vm83_vm0, %v290_v12  ;;  %v264_v12 = vadd.f32 %v263_v29, %v221_v55  ;;  %v240_v29 = vadd.f32 %v1453_v18, %v221_v55 }
 0x15a   :  { %615 = vmatpush.msrb.mxu0 %v264_v12 }
 0x160   :  { %1046 = vmatmul.msk.f32.gmra.mxu3 %vm83_vm0, %v291_v14  ;;  %v261_v14 = vadd.f32 %v260_v28, %v221_v55 }
 0x162   :  { %616 = vmatpush.msrb.mxu0 %v261_v14 }
 0x168   :  { %1047 = vmatmul.msk.f32.gmra.mxu3 %vm83_vm0, %v292_v20  ;;  %v258_v20 = vadd.f32 %v257_v27, %v221_v55 }
 0x16a   :  { %617 = vmatpush.msrb.mxu0 %v258_v20 }
 0x170   :  { %1048 = vmatmul.msk.f32.gmra.mxu3 %vm83_vm0, %v293_v21  ;;  %v255_v21 = vadd.f32 %v254_v19, %v221_v55 }
 0x172   :  { %618 = vmatpush.msrb.mxu0 %v255_v21 }
 0x178   :  { %1049 = vmatmul.msk.f32.gmra.mxu3 %vm83_vm0, %v294_v22  ;;  %v252_v22 = vadd.f32 %v1461_v26, %v221_v55 }
 0x17a   :  { %619 = vmatpush.msrb.mxu0 %v252_v22 }
 0x1c3   :  { %v384_v31 = vpop.f32.mrf.mxu3 }
 0x1c4   :  { %v1469_v32 = vadd.f32 %v384_v31, %v1466_v30  ;;  %v249_v31 = vadd.f32 %v1459_v25, %v221_v55 }
 0x1c6   :  { %408 = vmax.xlane.f32.xlu0 %v1469_v32  ;;  %620 = vmatpush.msrb.mxu0 %v249_v31 }
 0x1cb   :  { %v387_v35 = vpop.f32.mrf.mxu3 }
 0x1cc   :  { %v1478_v36 = vadd.f32 %v387_v35, %v1475_v34  ;;  %v246_v35 = vadd.f32 %v1457_v24, %v221_v55 }
 0x1ce   :  { %410 = vmax.xlane.f32.xlu0 %v1478_v36  ;;  %621 = vmatpush.msrb.mxu0 %v246_v35 }
 0x1d0   :  { %622 = vmatpush.msrb.mxu0 %v243_v33 }
 0x1d2   :  { %623 = vmatpush.msrb.mxu0 %v240_v29 }
 0x1d3   :  { %v390_v39 = vpop.f32.mrf.mxu3 }
 0x1d4   :  { %v1487_v40 = vadd.f32 %v390_v39, %v1484_v38 }
 0x1d6   :  { %412 = vmax.xlane.f32.xlu1 %v1487_v40 }
 0x1db   :  { %v393_v44 = vpop.f32.mrf.mxu3 }
 0x1dc   :  { %v1496_v45 = vadd.f32 %v393_v44, %v1493_v42 }
 0x1de   :  { %414 = vmax.xlane.f32.xlu1 %v1496_v45 }
 0x1e3   :  { %v396_v48 = vpop.f32.mrf.mxu3 }
 0x1e4   :  { %v1505_v49 = vadd.f32 %v396_v48, %v1502_v47 }
 0x1e6   :  { %416 = vmax.xlane.f32.xlu2 %v1505_v49 }
 0x1eb   :  { %v399_v52 = vpop.f32.mrf.mxu3 }
 0x1ec   :  { %v1514_v53 = vadd.f32 %v399_v52, %v1511_v51 }
 0x1ee   :  { %418 = vmax.xlane.f32.xlu2 %v1514_v53 }
 0x1f3   :  { %v402_v57 = vpop.f32.mrf.mxu3 }
 0x1f4   :  { %v1524_v58 = vadd.f32 %v402_v57, %v1521_v56 }
 0x1f6   :  { %420 = vmax.xlane.f32.xlu0 %v1524_v58 }
 0x1fb   :  { %v405_v3 = vpop.f32.mrf.mxu3 }
 0x1fc   :  { %v1533_v6 = vadd.f32 %v405_v3, %v1530_v63 }
 0x1fe   :  { %422 = vmax.xlane.f32.xlu2 %v1533_v6 }
 0x239   :  { %v409_v27 = vpop.xlane.xlu0 %408 }
 0x23a   :  { %v424_v19 = vsub.f32 %v1469_v32, %v409_v27 }
 0x23c   :  { %v432_v28 = vmul.f32 1.442695, %v424_v19 }
 0x23e   :  { %1071 = vpow2.f32 %v432_v28 }
 0x241   :  { %v411_v26 = vpop.xlane.xlu0 %410 }
 0x242   :  { %v425_v25 = vsub.f32 %v1478_v36, %v411_v26 }
 0x244   :  { %v1543_v37 = vpop.eup %1071  ;;  %v434_v24 = vmul.f32 1.442695, %v425_v25 }
 0x245   :  { %448 = vadd.xlane.f32.xlu1 %v1543_v37 }
 0x246   :  { %1073 = vpow2.f32 %v434_v24 }
 0x249   :  { %v413_v23 = vpop.xlane.xlu1 %412 }
 0x24a   :  { %v426_v18 = vsub.f32 %v1487_v40, %v413_v23 }
 0x24c   :  { %v1547_v39 = vpop.eup %1073  ;;  %v436_v41 = vmul.f32 1.442695, %v426_v18 }
 0x24d   :  { %450 = vadd.xlane.f32.xlu0 %v1547_v39 }
 0x24e   :  { %1075 = vpow2.f32 %v436_v41 }
 0x251   :  { %v415_v32 = vpop.xlane.xlu1 %414 }
 0x252   :  { %v427_v44 = vsub.f32 %v1496_v45, %v415_v32 }
 0x254   :  { %v1551_v46 = vpop.eup %1075  ;;  %v438_v36 = vmul.f32 1.442695, %v427_v44 }
 0x255   :  { %452 = vadd.xlane.f32.xlu1 %v1551_v46 }
 0x256   :  { %1077 = vpow2.f32 %v438_v36 }
 0x259   :  { %v417_v48 = vpop.xlane.xlu2 %416 }
 0x25a   :  { %v428_v50 = vsub.f32 %v1505_v49, %v417_v48 }
 0x25c   :  { %v1555_v52 = vpop.eup %1077  ;;  %v440_v40 = vmul.f32 1.442695, %v428_v50 }
 0x25d   :  { %454 = vadd.xlane.f32.xlu2 %v1555_v52 }
 0x25e   :  { %1079 = vpow2.f32 %v440_v40 }
 0x261   :  { %v419_v54 = vpop.xlane.xlu2 %418 }
 0x262   :  { %v429_v55 = vsub.f32 %v1514_v53, %v419_v54 }
 0x264   :  { %v1559_v57 = vpop.eup %1079  ;;  %v442_v45 = vmul.f32 1.442695, %v429_v55 }
 0x265   :  { %456 = vadd.xlane.f32.xlu0 %v1559_v57 }
 0x266   :  { %1081 = vpow2.f32 %v442_v45 }
 0x269   :  { %v421_v59 = vpop.xlane.xlu0 %420 }
 0x26a   :  { %v430_v60 = vsub.f32 %v1524_v58, %v421_v59 }
 0x26c   :  { %v1563_v61 = vpop.eup %1081  ;;  %v444_v49 = vmul.f32 1.442695, %v430_v60 }
 0x26d   :  { %458 = vadd.xlane.f32.xlu1 %v1563_v61 }
 0x26e   :  { %1083 = vpow2.f32 %v444_v49 }
 0x271   :  { %v423_v62 = vpop.xlane.xlu2 %422 }
 0x272   :  { %v431_v1 = vsub.f32 %v1533_v6, %v423_v62 }
 0x274   :  { %v1567_v2 = vpop.eup %1083  ;;  %v446_v53 = vmul.f32 1.442695, %v431_v1 }
 0x275   :  { %460 = vadd.xlane.f32.xlu2 %v1567_v2 }
 0x276   :  { %1085 = vpow2.f32 %v446_v53 }
 0x27c   :  { %v1570_v3 = vpop.eup %1085 }
 0x27d   :  { %462 = vadd.xlane.f32.xlu0 %v1570_v3 }
 0x2b8   :  { %v449_v58 = vpop.xlane.xlu1 %448 }
 0x2b9   :  { %1087 = vrcp.f32 %v449_v58  ;;  %v475_v20 = vand.u32 2147483648, %v449_v58  ;;  %v473_v6 = vand.u32 2147483647, %v449_v58  ;;  %vm469_vm2 = vweird.f32 %v449_v58 }
 0x2bb   :  { %v476_v35 = vor.u32 1.1754944e-38, %v475_v20  ;;  %vm474_vm4 = vcmp.eq.f32.partialorder %v473_v6, 8.507059e+37 }
 0x2bf   :  { %v1088_v8 = vpop.eup %1087 }
 0x2c0   :  { %v465_v10 = vmul.f32 %v1088_v8, %v449_v58  ;;  %v451_v12 = vpop.xlane.xlu0 %450  ;;  %vm470_vm1 = vweird.f32 %v1088_v8 }
 0x2c1   :  { %1089 = vrcp.f32 %v451_v12  ;;  %vm471_vm3 = vmor %vm469_vm2, %vm470_vm1  ;;  %v490_v25 = vand.u32 2147483648, %v451_v12  ;;  %v488_v18 = vand.u32 2147483647, %v451_v12  ;;  %vm484_vm7 = vweird.f32 %v451_v12 }
 0x2c2   :  { %v466_v14 = vsub.f32 1.0, %v465_v10 }
 0x2c3   :  { %v491_v44 = vor.u32 1.1754944e-38, %v490_v25  ;;  %vm489_vm9 = vcmp.eq.f32.partialorder %v488_v18, 8.507059e+37  ;;  %v59_v25 = vld [vmem:[%s1744_s2 + $0x90] sm:$0xff] }
 0x2c4   :  { %v467_v21 = vmul.f32 %v1088_v8, %v466_v14  ;;  %690 = vmatpush.msra.mxu0 %v59_v25 }
 0x2c6   :  { %v468_v22 = vadd.f32 %v1088_v8, %v467_v21 }
 0x2c7   :  { %v1090_v31 = vpop.eup %1089 }
 0x2c8   :  { %v480_v33 = vmul.f32 %v1090_v31, %v451_v12  ;;  %v453_v29 = vpop.xlane.xlu1 %452  ;;  %v472_v27 = vsel %vm471_vm3, %v1088_v8, %v468_v22  ;;  %vm485_vm6 = vweird.f32 %v1090_v31 }
 0x2c9   :  { %1091 = vrcp.f32 %v453_v29  ;;  %v477_v19 = vsel %vm474_vm4, %v476_v35, %v472_v27  ;;  %vm486_vm8 = vmor %vm484_vm7, %vm485_vm6  ;;  %v505_v54 = vand.u32 2147483648, %v453_v29  ;;  %v503_v59 = vand.u32 2147483647, %v453_v29 }
 0x2ca   :  { %v481_v28 = vsub.f32 1.0, %v480_v33  ;;  %v478_v26 = vmul.f32 %v1543_v37, %v477_v19  ;;  %vm499_vm12 = vweird.f32 %v453_v29 }
 0x2cb   :  { %v506_v62 = vor.u32 1.1754944e-38, %v505_v54  ;;  %vm504_vm14 = vcmp.eq.f32.partialorder %v503_v59, 8.507059e+37 }
 0x2cc   :  { %v482_v24 = vmul.f32 %v1090_v31, %v481_v28  ;;  %v592_v23 = vsel %vm584_vm5, %v478_v26, 0.0  ;;  %1050 = vmatmul.msk.f32.vlgmr.msrb.gmra.mxu0 %vm584_vm5, %v478_v26  ;;  %vm587_vm5 = vcmp.gt.f32.partialorder %v1493_v42, -5e+08 }
 0x2cd   :  { %600 = vst [vmem:[%s1747_s5] sm:$0xff] %v592_v23 }
 0x2ce   :  { %v483_v41 = vadd.f32 %v1090_v31, %v482_v24 }
 0x2cf   :  { %v1092_v32 = vpop.eup %1091 }
 0x2d0   :  { %v495_v30 = vmul.f32 %v1092_v32, %v453_v29  ;;  %v455_v36 = vpop.xlane.xlu2 %454  ;;  %v487_v48 = vsel %vm486_vm8, %v1090_v31, %v483_v41  ;;  %vm500_vm11 = vweird.f32 %v1092_v32 }
 0x2d1   :  { %1093 = vrcp.f32 %v455_v36  ;;  %v492_v37 = vsel %vm489_vm9, %v491_v44, %v487_v48  ;;  %vm501_vm13 = vmor %vm499_vm12, %vm500_vm11  ;;  %v520_v10 = vand.u32 2147483648, %v455_v36  ;;  %v518_v20 = vand.u32 2147483647, %v455_v36 }
 0x2d2   :  { %v496_v50 = vsub.f32 1.0, %v495_v30  ;;  %v493_v40 = vmul.f32 %v1547_v39, %v492_v37  ;;  %vm514_vm2 = vweird.f32 %v455_v36 }
 0x2d3   :  { %v521_v22 = vor.u32 1.1754944e-38, %v520_v10  ;;  %vm519_vm4 = vcmp.eq.f32.partialorder %v518_v20, 8.507059e+37 }
 0x2d4   :  { %v497_v55 = vmul.f32 %v1092_v32, %v496_v50  ;;  %v593_v45 = vsel %vm585_vm10, %v493_v40, 0.0  ;;  %1051 = vmatmul.msk.f32.gmra.mxu0 %vm585_vm10, %v493_v40  ;;  %vm588_vm10 = vcmp.gt.f32.partialorder %v1502_v47, -5e+08 }
 0x2d5   :  { %601 = vst [vmem:[%s1747_s5 + $0x8] sm:$0xff] %v593_v45 }
 0x2d6   :  { %v498_v60 = vadd.f32 %v1092_v32, %v497_v55 }
 0x2d7   :  { %v1094_v49 = vpop.eup %1093 }
 0x2d8   :  { %v510_v1 = vmul.f32 %v1094_v49, %v455_v36  ;;  %v457_v34 = vpop.xlane.xlu0 %456  ;;  %v502_v53 = vsel %vm501_vm13, %v1092_v32, %v498_v60  ;;  %vm515_vm1 = vweird.f32 %v1094_v49 }
 0x2d9   :  { %1095 = vrcp.f32 %v457_v34  ;;  %v507_v39 = vsel %vm504_vm14, %v506_v62, %v502_v53  ;;  %vm516_vm3 = vmor %vm514_vm2, %vm515_vm1  ;;  %v535_v27 = vand.u32 2147483648, %v457_v34  ;;  %v533_v26 = vand.u32 2147483647, %v457_v34 }
 0x2da   :  { %v511_v58 = vsub.f32 1.0, %v510_v1  ;;  %v508_v8 = vmul.f32 %v1551_v46, %v507_v39  ;;  %vm529_vm7 = vweird.f32 %v457_v34 }
 0x2db   :  { %v536_v23 = vor.u32 1.1754944e-38, %v535_v27  ;;  %vm534_vm9 = vcmp.eq.f32.partialorder %v533_v26, 8.507059e+37 }
 0x2dc   :  { %v512_v12 = vmul.f32 %v1094_v49, %v511_v58  ;;  %v594_v14 = vsel %vm586_vm15, %v508_v8, 0.0  ;;  %1052 = vmatmul.msk.f32.gmra.mxu0 %vm586_vm15, %v508_v8  ;;  %vm589_vm15 = vcmp.gt.f32.partialorder %v1511_v51, -5e+08 }
 0x2dd   :  { %602 = vst [vmem:[%s1747_s5 + $0x10] sm:$0xff] %v594_v14 }
 0x2de   :  { %v513_v21 = vadd.f32 %v1094_v49, %v512_v12 }
 0x2df   :  { %v1096_v6 = vpop.eup %1095 }
 0x2e0   :  { %v525_v31 = vmul.f32 %v1096_v6, %v457_v34  ;;  %v459_v38 = vpop.xlane.xlu1 %458  ;;  %v517_v35 = vsel %vm516_vm3, %v1094_v49, %v513_v21  ;;  %vm530_vm6 = vweird.f32 %v1096_v6 }
 0x2e1   :  { %1097 = vrcp.f32 %v459_v38  ;;  %v522_v46 = vsel %vm519_vm4, %v521_v22, %v517_v35  ;;  %vm531_vm8 = vmor %vm529_vm7, %vm530_vm6  ;;  %v550_v36 = vand.u32 2147483648, %v459_v38  ;;  %v548_v50 = vand.u32 2147483647, %v459_v38 }
 0x2e2   :  { %v526_v33 = vsub.f32 1.0, %v525_v31  ;;  %v523_v29 = vmul.f32 %v1555_v52, %v522_v46  ;;  %vm544_vm12 = vweird.f32 %v459_v38 }
 0x2e3   :  { %v551_v55 = vor.u32 1.1754944e-38, %v550_v36  ;;  %vm549_vm14 = vcmp.eq.f32.partialorder %v548_v50, 8.507059e+37 }
 0x2e4   :  { %v527_v19 = vmul.f32 %v1096_v6, %v526_v33  ;;  %v595_v28 = vsel %vm587_vm5, %v523_v29, 0.0  ;;  %1053 = vmatmul.msk.f32.gmra.mxu0 %vm587_vm5, %v523_v29  ;;  %vm590_vm5 = vcmp.gt.f32.partialorder %v1521_v56, -5e+08  ;;  %v58_v33 = vld [vmem:[%s1744_s2 + $0x68] sm:$0xff]  ;;  %v57_v29 = vld [vmem:[%s1744_s2 + $0x40] sm:$0xff] }
 0x2e5   :  { %603 = vst [vmem:[%s1747_s5 + $0x18] sm:$0xff] %v595_v28  ;;  %691 = vmatpush.msra.mxu0 %v58_v33 }
 0x2e6   :  { %v528_v24 = vadd.f32 %v1096_v6, %v527_v19 }
 0x2e7   :  { %v1098_v42 = vpop.eup %1097  ;;  %692 = vmatpush.msra.mxu0 %v57_v29 }
 0x2e8   :  { %v540_v52 = vmul.f32 %v1098_v42, %v459_v38  ;;  %v461_v18 = vpop.xlane.xlu2 %460  ;;  %v532_v41 = vsel %vm531_vm8, %v1096_v6, %v528_v24  ;;  %vm545_vm11 = vweird.f32 %v1098_v42 }
 0x2e9   :  { %1099 = vrcp.f32 %v461_v18  ;;  %v537_v32 = vsel %vm534_vm9, %v536_v23, %v532_v41  ;;  %vm546_vm13 = vmor %vm544_vm12, %vm545_vm11  ;;  %v565_v62 = vand.u32 2147483648, %v461_v18  ;;  %v563_v53 = vand.u32 2147483647, %v461_v18 }
 0x2ea   :  { %v541_v44 = vsub.f32 1.0, %v540_v52  ;;  %v538_v30 = vmul.f32 %v1559_v57, %v537_v32  ;;  %vm559_vm2 = vweird.f32 %v461_v18 }
 0x2eb   :  { %v566_v8 = vor.u32 1.1754944e-38, %v565_v62  ;;  %vm564_vm4 = vcmp.eq.f32.partialorder %v563_v53, 8.507059e+37  ;;  %v1146_v53 = vmov 32.0  }
 0x2ec   :  { %v542_v48 = vmul.f32 %v1098_v42, %v541_v44  ;;  %v596_v37 = vsel %vm588_vm10, %v538_v30, 0.0  ;;  %1054 = vmatmul.msk.f32.gmra.mxu0 %vm588_vm10, %v538_v30  ;;  %vm591_vm10 = vcmp.gt.f32.partialorder %v1530_v63, -5e+08  ;;  %v56_v63 = vld [vmem:[%s1744_s2 + $0x18] sm:$0xff] }
 0x2ed   :  { %604 = vst [vmem:[%s1747_s5 + $0x20] sm:$0xff] %v596_v37  ;;  %693 = vmatpush.msra.mxu0 %v56_v63  ;;  %v71_v63 = vld [vmem:[%s1745_s3 + $0x38] sm:$0xff] }
 0x2ee   :  { %v543_v40 = vadd.f32 %v1098_v42, %v542_v48  ;;  %901 = vmatpush.msrb.mxu3 %v71_v63 }
 0x2ef   :  { %v1100_v54 = vpop.eup %1099 }
 0x2f0   :  { %v555_v45 = vmul.f32 %v1100_v54, %v461_v18  ;;  %v463_v47 = vpop.xlane.xlu0 %462  ;;  %v547_v59 = vsel %vm546_vm13, %v1098_v42, %v543_v40  ;;  %vm560_vm1 = vweird.f32 %v1100_v54 }
 0x2f1   :  { %1101 = vrcp.f32 %v463_v47  ;;  %v552_v57 = vsel %vm549_vm14, %v551_v55, %v547_v59  ;;  %vm561_vm3 = vmor %vm559_vm2, %vm560_vm1  ;;  %v580_v20 = vand.u32 2147483648, %v463_v47  ;;  %v578_v22 = vand.u32 2147483647, %v463_v47 }
 0x2f2   :  { %v556_v60 = vsub.f32 1.0, %v555_v45  ;;  %v553_v49 = vmul.f32 %v1563_v61, %v552_v57  ;;  %vm574_vm7 = vweird.f32 %v463_v47  ;;  %1103 = vrcp.f32 %v1146_v53 }
 0x2f3   :  { %v581_v38 = vor.u32 1.1754944e-38, %v580_v20  ;;  %vm579_vm9 = vcmp.eq.f32.partialorder %v578_v22, 8.507059e+37 }
 0x2f4   :  { %v557_v1 = vmul.f32 %v1100_v54, %v556_v60  ;;  %v597_v34 = vsel %vm589_vm15, %v553_v49, 0.0  ;;  %1055 = vmatmul.msk.f32.gmra.mxu0 %vm589_vm15, %v553_v49 }
 0x2f5   :  { %605 = vst [vmem:[%s1747_s5 + $0x28] sm:$0xff] %v597_v34 }
 0x2f6   :  { %v558_v39 = vadd.f32 %v1100_v54, %v557_v1 }
 0x2f7   :  { %v1102_v58 = vpop.eup %1101 }
 0x2f8   :  { %v570_v10 = vmul.f32 %v1102_v58, %v463_v47  ;;  %v562_v51 = vsel %vm561_vm3, %v1100_v54, %v558_v39  ;;  %vm575_vm6 = vweird.f32 %v1102_v58  ;;  %v1104_v39 = vpop.eup %1103 }
 0x2f9   :  { %v567_v12 = vsel %vm564_vm4, %v566_v8, %v562_v51  ;;  %vm576_vm8 = vmor %vm574_vm7, %vm575_vm6  ;;  %vm714_vm11 = vweird.f32 %v1104_v39 }
 0x2fa   :  { %v571_v61 = vsub.f32 1.0, %v570_v10  ;;  %v568_v14 = vmul.f32 %v1567_v2, %v567_v12 }
 0x2fc   :  { %v572_v21 = vmul.f32 %v1102_v58, %v571_v61  ;;  %v598_v6 = vsel %vm590_vm5, %v568_v14, 0.0  ;;  %1056 = vmatmul.msk.f32.gmra.mxu0 %vm590_vm5, %v568_v14 }
 0x2fd   :  { %606 = vst [vmem:[%s1747_s5 + $0x30] sm:$0xff] %v598_v6 }
 0x2fe   :  { %v573_v31 = vadd.f32 %v1102_v58, %v572_v21 }
 0x300   :  { %v577_v35 = vsel %vm576_vm8, %v1102_v58, %v573_v31  ;;  %v710_v58 = vmul.f32 32.0, %v1104_v39 }
 0x301   :  { %v582_v56 = vsel %vm579_vm9, %v581_v38, %v577_v35  ;;  %v63_v35 = vld [vmem:[%s1744_s2 + $0x98] sm:$0xff] }
 0x302   :  { %v583_v2 = vmul.f32 %v1570_v3, %v582_v56  ;;  %v711_v8 = vsub.f32 1.0, %v710_v58  ;;  %779 = vmatpush.msrb.mxu0 %v63_v35  ;;  %v62_v56 = vld [vmem:[%s1744_s2 + $0x70] sm:$0xff] }
 0x304   :  { %v599_v46 = vsel %vm591_vm10, %v583_v2, 0.0  ;;  %1057 = vmatmul.msk.f32.gmra.mxu0 %vm591_vm10, %v583_v2  ;;  %v712_v10 = vmul.f32 %v1104_v39, %v711_v8  ;;  %v61_v2 = vld [vmem:[%s1744_s2 + $0x48] sm:$0xff]  ;;  %vm886_vm10 = vcmask 523264  }
 0x305   :  { %607 = vst [vmem:[%s1747_s5 + $0x38] sm:$0xff] %v599_v46  ;;  %780 = vmatpush.msrb.mxu0 %v62_v56  ;;  %v60_v46 = vld [vmem:[%s1744_s2 + $0x20] sm:$0xff] }
 0x306   :  { %v713_v51 = vadd.f32 %v1104_v39, %v712_v10 }
 0x307   :  { %781 = vmatpush.msrb.mxu0 %v61_v2 }
 0x308   :  { %v1648_v12 = vsel %vm714_vm11, %v1104_v39, %v713_v51 }
 0x309   :  { %782 = vmatpush.msrb.mxu0 %v60_v46  ;;  %v66_v46 = vld [vmem:[%s1745_s3 + $0x10] sm:$0xff] }
 0x349   :  { %v625_v27 = vpop.f32.mrf.mxu0 }
 0x34a   :  { %v649_v42 = vmul.f32 %v625_v27, %v1382_v0 }
 0x34c   :  { %v657_v18 = vsel %vm83_vm0, %v649_v42, 0.0 }
 0x351   :  { %v628_v3 = vpop.f32.mrf.mxu0 }
 0x352   :  { %v650_v37 = vmul.f32 %v628_v3, %v1393_v7  ;;  %v70_v3 = vld [vmem:[%s1745_s3 + $0x30] sm:$0xff] }
 0x353   :  { %902 = vmatpush.msrb.mxu3 %v70_v3  ;;  %v65_v3 = vld [vmem:[%s1745_s3 + $0x8] sm:$0xff] }
 0x354   :  { %v664_v40 = vsel %vm83_vm0, %v650_v37, 0.0  ;;  %v757_v37 = vperm.slane %v1344_v43, 5 }
 0x359   :  { %v631_v19 = vpop.f32.mrf.mxu0 }
 0x35a   :  { %v651_v24 = vmul.f32 %v631_v19, %v1404_v9 }
 0x35c   :  { %v658_v52 = vsel %vm83_vm0, %v651_v24, 0.0 }
 0x35d   :  { %v659_v32 = vadd.f32 %v658_v52, %v657_v18 }
 0x361   :  { %v634_v28 = vpop.f32.mrf.mxu0 }
 0x362   :  { %v652_v30 = vmul.f32 %v634_v28, %v1413_v11 }
 0x364   :  { %v665_v50 = vsel %vm83_vm0, %v652_v30, 0.0 }
 0x365   :  { %v666_v55 = vadd.f32 %v665_v50, %v664_v40 }
 0x369   :  { %v637_v26 = vpop.f32.mrf.mxu0 }
 0x36a   :  { %v653_v23 = vmul.f32 %v637_v26, %v1422_v13 }
 0x36c   :  { %v660_v41 = vsel %vm83_vm0, %v653_v23, 0.0 }
 0x36d   :  { %v661_v48 = vadd.f32 %v660_v41, %v659_v32 }
 0x371   :  { %v640_v25 = vpop.f32.mrf.mxu0 }
 0x372   :  { %v654_v9 = vmul.f32 %v640_v25, %v1431_v15  ;;  %v671_v15 = vperm.slane %v1344_v43, 3 }
 0x374   :  { %v667_v54 = vsel %vm83_vm0, %v654_v9, 0.0 }
 0x375   :  { %v668_v45 = vadd.f32 %v667_v54, %v666_v55 }
 0x379   :  { %v643_v44 = vpop.f32.mrf.mxu0 }
 0x37a   :  { %v655_v36 = vmul.f32 %v643_v44, %v1440_v16  ;;  %v754_v44 = vperm.slane %v1344_v43, 4 }
 0x37c   :  { %v662_v0 = vsel %vm83_vm0, %v655_v36, 0.0 }
 0x37d   :  { %v663_v13 = vadd.f32 %v662_v0, %v661_v48 }
 0x37f   :  { %1058 = vmatmul.msk.f32.vlgmr.msra.gmra.mxu0 %vm83_vm0, %v663_v13 }
 0x381   :  { %v646_v11 = vpop.f32.mrf.mxu0 }
 0x382   :  { %v656_v16 = vmul.f32 %v646_v11, %v1449_v17 }
 0x384   :  { %v669_v7 = vsel %vm83_vm0, %v656_v16, 0.0 }
 0x385   :  { %v670_v47 = vadd.f32 %v669_v7, %v668_v45  ;;  %v1147_v45 = vmov 1.4142135  }
 0x387   :  { %1059 = vmatmul.msk.f32.gmra.mxu0 %vm83_vm0, %v670_v47 }
 0x3fc   :  { %v695_v59 = vpop.f32.mrf.mxu0 }
 0x3fd   :  { %v696_v57 = vadd.f32 %v695_v59, %v671_v15 }
 0x3ff   :  { %v701_v60 = vadd.f32 %v696_v57, %v1196_v4 }
 0x401   :  { %v703_v49 = vsel %vm83_vm0, %v701_v60, 0.0 }
 0x402   :  { %704 = vadd.xlane.f32.xlu1 %v703_v49 }
 0x404   :  { %v698_v62 = vpop.f32.mrf.mxu0 }
 0x405   :  { %v699_v1 = vadd.f32 %v698_v62, %v671_v15 }
 0x407   :  { %v702_v34 = vadd.f32 %v699_v1, %v1203_v5 }
 0x409   :  { %v706_v17 = vsel %vm83_vm0, %v702_v34, 0.0 }
 0x40a   :  { %707 = vadd.xlane.f32.xlu2 %v706_v17 }
 0x475   :  { %v705_v4 = vpop.xlane.xlu1 %704 }
 0x476   :  { %v716_v61 = vmul.f32 %v1648_v12, %v705_v4 }
 0x478   :  { %v718_v14 = vsub.f32 %v701_v60, %v716_v61  ;;  %v760_v60 = vperm.slane %v1344_v43, 6  ;;  %v69_v43 = vld [vmem:[%s1745_s3 + $0x28] sm:$0xff] }
 0x479   :  { %903 = vmatpush.msrb.mxu3 %v69_v43 }
 0x47a   :  { %v720_v20 = vmul.f32 %v718_v14, %v718_v14 }
 0x47c   :  { %v722_v5 = vsel %vm83_vm0, %v720_v20, 0.0 }
 0x47d   :  { %723 = vadd.xlane.f32.xlu0 %v722_v5  ;;  %v708_v21 = vpop.xlane.xlu2 %707 }
 0x47e   :  { %v717_v6 = vmul.f32 %v1648_v12, %v708_v21  ;;  %v68_v21 = vld [vmem:[%s1745_s3 + $0x20] sm:$0xff] }
 0x47f   :  { %904 = vmatpush.msrb.mxu3 %v68_v21 }
 0x480   :  { %v719_v22 = vsub.f32 %v702_v34, %v717_v6 }
 0x482   :  { %v721_v31 = vmul.f32 %v719_v22, %v719_v22 }
 0x484   :  { %v725_v38 = vsel %vm83_vm0, %v721_v31, 0.0 }
 0x485   :  { %726 = vadd.xlane.f32.xlu1 %v725_v38  ;;  %v67_v38 = vld [vmem:[%s1745_s3 + $0x18] sm:$0xff] }
 0x486   :  { %905 = vmatpush.msrb.mxu3 %v67_v38 }
 0x488   :  { %906 = vmatpush.msrb.mxu3 %v66_v46 }
 0x48a   :  { %907 = vmatpush.msrb.mxu3 %v65_v3 }
 0x4f0   :  { %v724_v33 = vpop.xlane.xlu0 %723 }
 0x4f1   :  { %v728_v29 = vmul.f32 %v724_v33, %v1648_v12 }
 0x4f3   :  { %v730_v27 = vadd.f32 1e-05, %v728_v29 }
 0x4f5   :  { %1105 = vrsqrt.f32 %v730_v27  ;;  %vm738_vm13 = vweird.f32 %v730_v27 }
 0x4f8   :  { %v727_v19 = vpop.xlane.xlu1 %726 }
 0x4f9   :  { %v729_v28 = vmul.f32 %v727_v19, %v1648_v12 }
 0x4fb   :  { %v1106_v26 = vpop.eup %1105  ;;  %v731_v25 = vadd.f32 1e-05, %v729_v28 }
 0x4fc   :  { %v733_v24 = vmul.f32 %v1106_v26, %v730_v27  ;;  %vm739_vm12 = vweird.f32 %v1106_v26 }
 0x4fd   :  { %1107 = vrsqrt.f32 %v731_v25  ;;  %vm740_vm14 = vmor %vm738_vm13, %vm739_vm12  ;;  %vm748_vm1 = vweird.f32 %v731_v25 }
 0x4fe   :  { %v734_v42 = vmul.f32 %v1106_v26, %v733_v24  ;;  %1109 = vrcp.f32 %v1147_v45 }
 0x500   :  { %v735_v23 = vmul.f32 0.5, %v734_v42 }
 0x502   :  { %v736_v52 = vsub.f32 1.5, %v735_v23 }
 0x503   :  { %v1108_v18 = vpop.eup %1107 }
 0x504   :  { %v737_v41 = vmul.f32 %v1106_v26, %v736_v52  ;;  %v743_v32 = vmul.f32 %v1108_v18, %v731_v25  ;;  %vm749_vm15 = vweird.f32 %v1108_v18  ;;  %v1110_v7 = vpop.eup %1109  ;;  %v64_v25 = vld [vmem:[%s1745_s3] sm:$0xff] }
 0x505   :  { %vm750_vm2 = vmor %vm748_vm1, %vm749_vm15  ;;  %v793_v47 = vmul.f32 1.4142135, %v1110_v7  ;;  %vm797_vm3 = vweird.f32 %v1110_v7  ;;  %908 = vmatpush.msrb.mxu3 %v64_v25 }
 0x506   :  { %v741_v30 = vsel %vm740_vm14, %v1106_v26, %v737_v41  ;;  %v744_v36 = vmul.f32 %v1108_v18, %v743_v32 }
 0x507   :  { %v752_v48 = vmul.f32 %v741_v30, %v718_v14  ;;  %v794_v15 = vsub.f32 1.0, %v793_v47 }
 0x508   :  { %v745_v9 = vmul.f32 0.5, %v744_v36 }
 0x509   :  { %v755_v0 = vmul.f32 %v754_v44, %v752_v48  ;;  %v795_v59 = vmul.f32 %v1110_v7, %v794_v15 }
 0x50a   :  { %v746_v13 = vsub.f32 1.5, %v745_v9 }
 0x50b   :  { %v1676_v50 = vadd.f32 %v757_v37, %v755_v0  ;;  %v796_v57 = vadd.f32 %v1110_v7, %v795_v59 }
 0x50c   :  { %v747_v40 = vmul.f32 %v1108_v18, %v746_v13 }
 0x50d   :  { %1060 = vmatmul.msk.f32.vlgmr.msrb.gmra.mxu0 %vm83_vm0, %v1676_v50  ;;  %v798_v62 = vsel %vm797_vm3, %v1110_v7, %v796_v57 }
 0x50e   :  { %v751_v54 = vsel %vm750_vm2, %v1108_v18, %v747_v40 }
 0x50f   :  { %v753_v55 = vmul.f32 %v751_v54, %v719_v22 }
 0x511   :  { %v756_v11 = vmul.f32 %v754_v44, %v753_v55 }
 0x513   :  { %v1680_v16 = vadd.f32 %v757_v37, %v756_v11 }
 0x515   :  { %1061 = vmatmul.msk.f32.gmra.mxu0 %vm83_vm0, %v1680_v16 }
 0x58a   :  { %v784_v49 = vpop.f32.mrf.mxu0 }
 0x58b   :  { %v1685_v1 = vadd.f32 %v784_v49, %v760_v60 }
 0x58d   :  { %v1688_v34 = vmul.f32 %v798_v62, %v1685_v1 }
 0x58f   :  { %v801_v17 = vmul.f32 %v1688_v34, %v1688_v34 }
 0x591   :  { %v802_v53 = vmin.f32 %v801_v17, 16.0 }
 0x592   :  { %v787_v39 = vpop.f32.mrf.mxu0 }
 0x593   :  { %v803_v58 = vmul.f32 2.1237322e-06, %v802_v53  ;;  %v814_v8 = vmul.f32 3.8918573e-05, %v802_v53  ;;  %v1692_v10 = vadd.f32 %v787_v39, %v760_v60 }
 0x595   :  { %v804_v51 = vadd.f32 0.00028619796, %v803_v58  ;;  %v815_v4 = vadd.f32 0.001143296, %v814_v8  ;;  %v1698_v61 = vmul.f32 %v798_v62, %v1692_v10 }
 0x597   :  { %v805_v14 = vmul.f32 %v804_v51, %v802_v53  ;;  %v816_v20 = vmul.f32 %v815_v4, %v802_v53  ;;  %v841_v5 = vmul.f32 %v1698_v61, %v1698_v61 }
 0x599   :  { %v817_v6 = vadd.f32 0.014752088, %v816_v20  ;;  %v842_v22 = vmin.f32 %v841_v5, 16.0  ;;  %v806_v31 = vadd.f32 0.0036580483, %v805_v14 }
 0x59b   :  { %v818_v35 = vmul.f32 %v817_v6, %v802_v53  ;;  %v843_v56 = vmul.f32 2.1237322e-06, %v842_v22  ;;  %v854_v2 = vmul.f32 3.8918573e-05, %v842_v22  ;;  %v807_v27 = vmul.f32 %v806_v31, %v802_v53 }
 0x59c   :  { %v790_v31 = vmul.f32 0.5, %v1685_v1  ;;  %v1119_v1 = vld [vmem:[%s1745_s3 + $0x80] sm:$0xff] }
 0x59d   :  { %v819_v33 = vadd.f32 0.112945676, %v818_v35  ;;  %v844_v29 = vadd.f32 0.00028619796, %v843_v56  ;;  %v855_v63 = vadd.f32 0.001143296, %v854_v2 }
 0x59e   :  { %v808_v42 = vadd.f32 0.05243302, %v807_v27  ;;  %v791_v27 = vmul.f32 0.5, %v1692_v10 }
 0x59f   :  { %v820_v19 = vmul.f32 %v819_v33, %v802_v53  ;;  %v845_v28 = vmul.f32 %v844_v29, %v842_v22  ;;  %v856_v26 = vmul.f32 %v855_v63, %v842_v22 }
 0x5a0   :  { %v809_v44 = vmul.f32 %v808_v42, %v802_v53 }
 0x5a1   :  { %v821_v24 = vadd.f32 0.4994258, %v820_v19  ;;  %v857_v23 = vadd.f32 0.014752088, %v856_v26  ;;  %v846_v18 = vadd.f32 0.0036580483, %v845_v28 }
 0x5a2   :  { %v810_v37 = vadd.f32 0.18741608, %v809_v44  ;;  %v885_v19 = vperm.slane %v1119_v1, 7 }
 0x5a3   :  { %v822_v52 = vmul.f32 %v821_v24, %v802_v53  ;;  %v858_v41 = vmul.f32 %v857_v23, %v842_v22  ;;  %v847_v36 = vmul.f32 %v846_v18, %v842_v22 }
 0x5a4   :  { %v811_v54 = vmul.f32 %v810_v37, %v802_v53 }
 0x5a5   :  { %v823_v32 = vadd.f32 1.0, %v822_v52  ;;  %v859_v30 = vadd.f32 0.112945676, %v858_v41  ;;  %v848_v0 = vadd.f32 0.05243302, %v847_v36 }
 0x5a6   :  { %v812_v15 = vadd.f32 1.1283791, %v811_v54 }
 0x5a7   :  { %1111 = vrcp.f32 %v823_v32  ;;  %v860_v48 = vmul.f32 %v859_v30, %v842_v22  ;;  %v849_v45 = vmul.f32 %v848_v0, %v842_v22  ;;  %v835_v47 = vand.u32 2147483648, %v823_v32 }
 0x5a8   :  { %v833_v57 = vand.u32 2147483647, %v823_v32  ;;  %vm829_vm5 = vweird.f32 %v823_v32  ;;  %v813_v39 = vmul.f32 %v812_v15, %v1688_v34 }
 0x5a9   :  { %v861_v9 = vadd.f32 0.4994258, %v860_v48  ;;  %v850_v60 = vadd.f32 0.18741608, %v849_v45  ;;  %v836_v62 = vor.u32 1.1754944e-38, %v835_v47  ;;  %v81_v47 = vld [vmem:[%s1745_s3 + $0x88] sm:$0xff] }
 0x5aa   :  { %vm834_vm7 = vcmp.eq.f32.partialorder %v833_v57, 8.507059e+37  ;;  %s1148_s3 = smov [#allocation2]  }
 0x5ab   :  { %v862_v13 = vmul.f32 %v861_v9, %v842_v22  ;;  %v851_v8 = vmul.f32 %v850_v60, %v842_v22  ;;  %v962_v60 = vperm.slane %v81_v47, 0  ;;  %s974_s27 = sshll.u32 %s1148_s3, 4  ;;  %s975_s27 = int_to_ptr.vmem [resolvable:$true] %s974_s27 }
 0x5ad   :  { %v1112_v40 = vpop.eup %1111  ;;  %v863_v11 = vadd.f32 1.0, %v862_v13  ;;  %v852_v5 = vadd.f32 1.1283791, %v851_v8 }
 0x5ae   :  { %v825_v55 = vmul.f32 %v1112_v40, %v823_v32  ;;  %vm830_vm4 = vweird.f32 %v1112_v40 }
 0x5af   :  { %1113 = vrcp.f32 %v863_v11  ;;  %vm831_vm6 = vmor %vm829_vm5, %vm830_vm4  ;;  %v875_v20 = vand.u32 2147483648, %v863_v11  ;;  %v873_v6 = vand.u32 2147483647, %v863_v11  ;;  %vm869_vm9 = vweird.f32 %v863_v11 }
 0x5b0   :  { %v826_v7 = vsub.f32 1.0, %v825_v55  ;;  %v853_v22 = vmul.f32 %v852_v5, %v1698_v61 }
 0x5b1   :  { %v876_v56 = vor.u32 1.1754944e-38, %v875_v20  ;;  %vm874_vm12 = vcmp.eq.f32.partialorder %v873_v6, 8.507059e+37 }
 0x5b2   :  { %v827_v59 = vmul.f32 %v1112_v40, %v826_v7 }
 0x5b4   :  { %v828_v49 = vadd.f32 %v1112_v40, %v827_v59 }
 0x5b5   :  { %v1114_v17 = vpop.eup %1113 }
 0x5b6   :  { %v832_v58 = vsel %vm831_vm6, %v1112_v40, %v828_v49  ;;  %v865_v51 = vmul.f32 %v1114_v17, %v863_v11  ;;  %vm870_vm8 = vweird.f32 %v1114_v17 }
 0x5b7   :  { %v837_v53 = vsel %vm834_vm7, %v836_v62, %v832_v58  ;;  %vm871_vm11 = vmor %vm869_vm9, %vm870_vm8 }
 0x5b8   :  { %v838_v4 = vmul.f32 %v837_v53, %v813_v39  ;;  %v866_v43 = vsub.f32 1.0, %v865_v51  ;;  %v965_v39 = vperm.slane %v81_v47, 1 }
 0x5ba   :  { %v1062_v14 = vclamps-f32 %v838_v4, 1.0  ;;  %v867_v21 = vmul.f32 %v1114_v17, %v866_v43 }
 0x5bc   :  { %v881_v38 = vadd.f32 1.0, %v1062_v14  ;;  %v868_v35 = vadd.f32 %v1114_v17, %v867_v21 }
 0x5be   :  { %v883_v34 = vmul.f32 %v881_v38, %v790_v31  ;;  %v872_v2 = vsel %vm871_vm11, %v1114_v17, %v868_v35 }
 0x5bf   :  { %v877_v46 = vsel %vm874_vm12, %v876_v56, %v872_v2 }
 0x5c0   :  { %1064 = vmatmul.msk.f32.vlgmr.msrb.gmra.mxu3 %vm886_vm10, %v883_v34  ;;  %v878_v33 = vmul.f32 %v877_v46, %v853_v22 }
 0x5c2   :  { %v1063_v29 = vclamps-f32 %v878_v33, 1.0 }
 0x5c4   :  { %v882_v63 = vadd.f32 1.0, %v1063_v29 }
 0x5c6   :  { %v884_v3 = vmul.f32 %v882_v63, %v791_v27 }
 0x5c8   :  { %1065 = vmatmul.msk.f32.gmra.mxu3 %vm886_vm10, %v884_v3 }
 0x643   :  { %v910_v28 = vpop.f32.mrf.mxu3 }
 0x644   :  { %v911_v26 = vadd.f32 %v910_v28, %v885_v19 }
 0x646   :  { %v916_v61 = vadd.f32 %v911_v26, %v1676_v50 }
 0x648   :  { %v918_v25 = vsel %vm83_vm0, %v916_v61, 0.0 }
 0x649   :  { %919 = vadd.xlane.f32.xlu2 %v918_v25 }
 0x64b   :  { %v913_v24 = vpop.f32.mrf.mxu3 }
 0x64c   :  { %v914_v42 = vadd.f32 %v913_v24, %v885_v19 }
 0x64e   :  { %v917_v23 = vadd.f32 %v914_v42, %v1680_v16 }
 0x650   :  { %v921_v10 = vsel %vm83_vm0, %v917_v23, 0.0 }
 0x651   :  { %922 = vadd.xlane.f32.xlu0 %v921_v10 }
 0x6bc   :  { %v920_v52 = vpop.xlane.xlu2 %919 }
 0x6bd   :  { %v924_v18 = vmul.f32 %v920_v52, %v1648_v12 }
 0x6bf   :  { %v926_v41 = vsub.f32 %v916_v61, %v924_v18 }
 0x6c1   :  { %v928_v32 = vmul.f32 %v926_v41, %v926_v41 }
 0x6c3   :  { %v930_v44 = vsel %vm83_vm0, %v928_v32, 0.0 }
 0x6c4   :  { %931 = vadd.xlane.f32.xlu1 %v930_v44  ;;  %v923_v30 = vpop.xlane.xlu0 %922 }
 0x6c5   :  { %v925_v50 = vmul.f32 %v923_v30, %v1648_v12 }
 0x6c7   :  { %v927_v36 = vsub.f32 %v917_v23, %v925_v50 }
 0x6c9   :  { %v929_v48 = vmul.f32 %v927_v36, %v927_v36 }
 0x6cb   :  { %v933_v37 = vsel %vm83_vm0, %v929_v48, 0.0 }
 0x6cc   :  { %934 = vadd.xlane.f32.xlu2 %v933_v37 }
 0x737   :  { %v932_v16 = vpop.xlane.xlu1 %931 }
 0x738   :  { %v936_v9 = vmul.f32 %v932_v16, %v1648_v12 }
 0x73a   :  { %v938_v0 = vadd.f32 1e-05, %v936_v9 }
 0x73c   :  { %1115 = vrsqrt.f32 %v938_v0  ;;  %vm946_vm14 = vweird.f32 %v938_v0 }
 0x73f   :  { %v935_v13 = vpop.xlane.xlu2 %934 }
 0x740   :  { %v937_v40 = vmul.f32 %v935_v13, %v1648_v12 }
 0x742   :  { %v1116_v54 = vpop.eup %1115  ;;  %v939_v11 = vadd.f32 1e-05, %v937_v40 }
 0x743   :  { %v941_v55 = vmul.f32 %v1116_v54, %v938_v0  ;;  %vm947_vm13 = vweird.f32 %v1116_v54 }
 0x744   :  { %1117 = vrsqrt.f32 %v939_v11  ;;  %vm948_vm15 = vmor %vm946_vm14, %vm947_vm13  ;;  %vm956_vm2 = vweird.f32 %v939_v11 }
 0x745   :  { %v942_v45 = vmul.f32 %v1116_v54, %v941_v55 }
 0x747   :  { %v943_v7 = vmul.f32 0.5, %v942_v45 }
 0x749   :  { %v944_v15 = vsub.f32 1.5, %v943_v7 }
 0x74a   :  { %v1118_v59 = vpop.eup %1117 }
 0x74b   :  { %v945_v57 = vmul.f32 %v1116_v54, %v944_v15  ;;  %v951_v49 = vmul.f32 %v1118_v59, %v939_v11  ;;  %vm957_vm1 = vweird.f32 %v1118_v59 }
 0x74c   :  { %vm958_vm3 = vmor %vm956_vm2, %vm957_vm1 }
 0x74d   :  { %v949_v62 = vsel %vm948_vm15, %v1116_v54, %v945_v57  ;;  %v952_v17 = vmul.f32 %v1118_v59, %v951_v49 }
 0x74e   :  { %v960_v12 = vmul.f32 %v949_v62, %v926_v41 }
 0x74f   :  { %v953_v53 = vmul.f32 0.5, %v952_v17 }
 0x750   :  { %v963_v58 = vmul.f32 %v962_v60, %v960_v12 }
 0x751   :  { %v954_v8 = vsub.f32 1.5, %v953_v53 }
 0x752   :  { %v966_v51 = vadd.f32 %v965_v39, %v963_v58 }
 0x753   :  { %v955_v4 = vmul.f32 %v1118_v59, %v954_v8 }
 0x754   :  { %968 = vst.msk [vmem:[#allocation2] sm:$0xff] %vm83_vm0, %v966_v51 }
 0x755   :  { %v959_v43 = vsel %vm958_vm3, %v1118_v59, %v955_v4 }
 0x756   :  { %v961_v14 = vmul.f32 %v959_v43, %v927_v36 }
 0x758   :  { %v964_v20 = vmul.f32 %v962_v60, %v961_v14 }
 0x75a   :  { %v967_v5 = vadd.f32 %v965_v39, %v964_v20 }
 0x75c   :  { %969 = vst.msk [vmem:[#allocation2 + $0x8] sm:$0xff] %vm83_vm0, %v967_v5 }
 0x75d   :  { %982 = dma.vmem_to_hbm [thread:$0]  %s975_s27, 256, %s977_s29, [#allocation3], %s1149_s30, %s1149_s30, %s1150_s1  }
 0x75e   :  { %1144 = dma.done.wait [#allocation3], 256  }
 0x75f   :  { %1145 = vsyncadd [#allocation3], 4294967040 }
 0x760   :  { %991 = vsyncpa [#allocation3], 1 }

</bundles_post_ra>
